<compile_context>
chip_gen: v5e
topology: v5e:2x2
jax: 0.10.0
libtpu: 0.0.40
codegen_flags: <defaults>
</compile_context>

<pallas_src>
import math
import jax
import jax.numpy as jnp
from jax.experimental import pallas as pl
from jax.experimental.pallas import tpu as pltpu

# ---------------- small synthetic T5-encoder config ----------------
VOCAB = 64
D_MODEL = 32
N_HEADS = 4
D_KV = 8                      # per-head dim; inner_dim = N_HEADS * D_KV = 32
D_FF = 64
N_LAYERS = 2
NUM_BUCKETS = 32
MAX_DISTANCE = 128
LN_EPS = 1e-6
NEG_INF = -1e9                # additive mask value for padded key positions


# ---------------- fused Pallas kernel: whole encoder + pooling ----------------
def _t5_encoder_kernel(h_ref, bias_ref, addmask_ref, poolw_ref,
                       wqkv_ref, wo_ref, wi_ref, woff_ref, finln_ref,
                       out_ref):
    S, D = h_ref.shape[1], h_ref.shape[2]
    H, Dk = N_HEADS, D_KV
    I = H * Dk

    def rms(x):
        # T5LayerNorm (RMS, no mean subtraction); the learned scale has been
        # folded into the downstream weight matrices in the wrapper.
        var = jnp.mean(x * x, axis=-1, keepdims=True)
        return x * jax.lax.rsqrt(var + LN_EPS)

    # residual stream for this example stays resident in VMEM/vregs
    h = h_ref[0]                                               # [S, D]

    # relative-position bias + additive key mask, combined once per grid step
    # ([H,S,S] + [1,S] broadcast) and reused by every layer.
    bm = bias_ref[...] + addmask_ref[0]                        # [H, S, S]

    for l in range(N_LAYERS):                                  # static unroll
        # ---- self-attention block (pre-norm, residual) ----
        x = rms(h)
        # fused QKV projection: one MXU pass, lane width 3*inner
        qkv = jnp.dot(x, wqkv_ref[l],
                      preferred_element_type=jnp.float32)      # [S, 3I]
        q = qkv[:, 0 * I:1 * I].reshape(S, H, Dk)
        k = qkv[:, 1 * I:2 * I].reshape(S, H, Dk)
        v = qkv[:, 2 * I:3 * I].reshape(S, H, Dk)

        # all heads at once (batched over H). T5 does NOT scale by 1/sqrt(d_kv):
        # scores = q k^T + bias + mask
        s = jnp.einsum('qhd,khd->hqk', q, k,
                       preferred_element_type=jnp.float32)     # [H, S, S]
        s = s + bm
        s = s - jnp.max(s, axis=-1, keepdims=True)
        p = jnp.exp(s)
        # approx reciprocal runs on the EUP slot; tiny relative error vs exact
        # softmax (use approx=False if bit parity with PyTorch is required).
        p = p * pl.reciprocal(jnp.sum(p, axis=-1, keepdims=True), approx=True)
        ctx = jnp.einsum('hqk,khd->qhd', p, v,
                         preferred_element_type=jnp.float32)   # [S, H, Dk]
        # single output projection with contraction dim I (== concat(heads)@wo)
        h = h + jnp.dot(ctx.reshape(S, I), wo_ref[l],
                        preferred_element_type=jnp.float32)

        # ---- feed-forward block (pre-norm, residual) ----
        x = rms(h)
        ff = jnp.maximum(jnp.dot(x, wi_ref[l],
                                 preferred_element_type=jnp.float32), 0.0)
        h = h + jnp.dot(ff, woff_ref[l],
                        preferred_element_type=jnp.float32)

    # final RMS norm; its scale is applied after pooling (exact fold since the
    # scale is per-feature).  Masked mean pooling == pool_w @ h.
    h = rms(h)                                                 # [S, D]
    pooled = jnp.dot(poolw_ref[0], h,
                     preferred_element_type=jnp.float32)       # [1, D]
    out_ref[0] = pooled * finln_ref[...]


# ---------------- plain-JAX glue ----------------
def relative_position_bias(rel_table, S):
    """T5 bucketed relative position bias (bidirectional). Returns [H, S, S]."""
    ctx = jnp.arange(S)[:, None]
    mem = jnp.arange(S)[None, :]
    rel_pos = mem - ctx                                   # [S, S]
    nb = NUM_BUCKETS // 2
    buckets = (rel_pos > 0).astype(jnp.int32) * nb
    rp = jnp.abs(rel_pos)
    max_exact = nb // 2
    is_small = rp < max_exact
    rp_large = max_exact + (
        jnp.log(rp.astype(jnp.float32) / max_exact + 1e-20)
        / math.log(MAX_DISTANCE / max_exact)
        * (nb - max_exact)
    ).astype(jnp.int32)
    rp_large = jnp.minimum(rp_large, nb - 1)
    buckets = buckets + jnp.where(is_small, rp, rp_large)
    bias = jnp.take(rel_table, buckets, axis=0)           # [S, S, H]
    return jnp.transpose(bias, (2, 0, 1))                 # [H, S, S]


def init_params(key):
    scale = 0.05
    inner = N_HEADS * D_KV

    def nxt():
        nonlocal key
        key, sub = jax.random.split(key)
        return sub

    def dense(shape):
        return jax.random.normal(nxt(), shape, jnp.float32) * scale

    wqkv, wo, wi, wo_ff = [], [], [], []
    embed = dense((VOCAB, D_MODEL))
    rel_bias = dense((NUM_BUCKETS, N_HEADS))
    for _ in range(N_LAYERS):
        wq = dense((D_MODEL, inner))
        wk = dense((D_MODEL, inner))
        wv = dense((D_MODEL, inner))
        wqkv.append(jnp.concatenate([wq, wk, wv], axis=1))          # [D, 3I]
        wo.append(dense((inner, D_MODEL)))
        wi.append(dense((D_MODEL, D_FF)))
        wo_ff.append(dense((D_FF, D_MODEL)))

    return {
        "embed": embed,
        "rel_bias": rel_bias,
        "ln1": jnp.ones((N_LAYERS, 1, D_MODEL), jnp.float32),
        "wqkv": jnp.stack(wqkv),                                    # [L, D, 3I]
        "wo": jnp.stack(wo),                                        # [L, I, D]
        "ln2": jnp.ones((N_LAYERS, 1, D_MODEL), jnp.float32),
        "wi": jnp.stack(wi),                                        # [L, D, F]
        "wo_ff": jnp.stack(wo_ff),                                  # [L, F, D]
        "final_ln": jnp.ones((1, D_MODEL), jnp.float32),
    }


def t5_encoder_mean_pool(params, input_ids, attention_mask):
    B, S = input_ids.shape
    D = D_MODEL
    inner = N_HEADS * D_KV

    # embedding gather + bias-bucket gather stay in plain JAX (data-dependent
    # gathers with no clean Pallas equivalent at this size; one-time ops).
    h0 = jnp.take(params["embed"], input_ids, axis=0)               # [B, S, D]
    pos_bias = relative_position_bias(params["rel_bias"], S)        # [H, S, S]

    maskf = attention_mask.astype(jnp.float32)                      # [B, S]
    add_mask = ((1.0 - maskf) * NEG_INF).reshape(B, 1, S)           # [B, 1, S]
    inv_cnt = 1.0 / jnp.maximum(jnp.sum(maskf, axis=1, keepdims=True), 1e-9)
    pool_w = (maskf * inv_cnt).reshape(B, 1, S)                     # [B, 1, S]

    # fold RMSNorm scales into the downstream weights: (x*w)@W == x@(diag(w)W)
    wqkv = params["wqkv"] * jnp.transpose(params["ln1"], (0, 2, 1))  # [L, D, 3I]
    wi = params["wi"] * jnp.transpose(params["ln2"], (0, 2, 1))      # [L, D, F]

    out = pl.pallas_call(
        _t5_encoder_kernel,
        out_shape=jax.ShapeDtypeStruct((B, 1, D), jnp.float32),
        grid=(B,),
        in_specs=[
            pl.BlockSpec((1, S, D), lambda b: (b, 0, 0)),            # h0 (per-example)
            pl.BlockSpec((N_HEADS, S, S), lambda b: (0, 0, 0)),      # pos bias (shared)
            pl.BlockSpec((1, 1, S), lambda b: (b, 0, 0)),            # additive key mask
            pl.BlockSpec((1, 1, S), lambda b: (b, 0, 0)),            # pooling weights
            pl.BlockSpec((N_LAYERS, D, 3 * inner), lambda b: (0, 0, 0)),   # wqkv (ln1 folded)
            pl.BlockSpec((N_LAYERS, inner, D), lambda b: (0, 0, 0)),       # wo
            pl.BlockSpec((N_LAYERS, D, D_FF), lambda b: (0, 0, 0)),        # wi (ln2 folded)
            pl.BlockSpec((N_LAYERS, D_FF, D), lambda b: (0, 0, 0)),        # wo_ff
            pl.BlockSpec((1, D), lambda b: (0, 0)),                        # final_ln
        ],
        out_specs=pl.BlockSpec((1, 1, D), lambda b: (b, 0, 0)),
        compiler_params=pltpu.CompilerParams(
            dimension_semantics=("parallel",)),                      # megacore on v7x
    )(h0, pos_bias, add_mask, pool_w,
      wqkv, params["wo"], wi, params["wo_ff"], params["final_ln"])

    return out.reshape(B, D)


if __name__ == "__main__":
    key = jax.random.PRNGKey(0)
    pkey, ikey = jax.random.split(key)
    params = init_params(pkey)

    B, S = 2, 8
    input_ids = jax.random.randint(ikey, (B, S), 0, VOCAB, dtype=jnp.int32)
    attention_mask = jnp.array([[1, 1, 1, 1, 1, 1, 0, 0],
                                [1, 1, 1, 1, 0, 0, 0, 0]], dtype=jnp.int32)

    fwd = jax.jit(t5_encoder_mean_pool)
    out = fwd(params, input_ids, attention_mask)
    jax.block_until_ready(out)

    assert out.shape == (B, D_MODEL), out.shape
    assert bool(jnp.all(jnp.isfinite(out)))
    print("KERNEL_OK")
</pallas_src>

<mosaic_0001>
module attributes {stable_mosaic.version = 11 : i64} {
  func.func @_t5_encoder_kernel(%arg0: i32, %arg1: memref<1x8x32xf32, #tpu.memory_space<vmem>>, %arg2: memref<4x8x8xf32, #tpu.memory_space<vmem>>, %arg3: memref<1x1x8xf32, #tpu.memory_space<vmem>>, %arg4: memref<1x1x8xf32, #tpu.memory_space<vmem>>, %arg5: memref<2x32x96xf32, #tpu.memory_space<vmem>>, %arg6: memref<2x32x32xf32, #tpu.memory_space<vmem>>, %arg7: memref<2x32x64xf32, #tpu.memory_space<vmem>>, %arg8: memref<2x64x32xf32, #tpu.memory_space<vmem>>, %arg9: memref<1x32xf32, #tpu.memory_space<vmem>>, %arg10: memref<1x1x32xf32, #tpu.memory_space<vmem>>) attributes {dimension_semantics = [#tpu.dimension_semantics<parallel>], iteration_bounds = array<i64: 2>, scalar_prefetch = 0 : i64, scratch_operands = 0 : i64, tpu.core_type = #tpu.core_type<tc>, window_params = [{transform_indices = @transform_0, window_bounds = array<i64: 1, 8, 32>}, {pipeline_mode = #tpu.pipeline_mode<synchronous>, transform_indices = @transform_1, window_bounds = array<i64: 4, 8, 8>}, {transform_indices = @transform_2, window_bounds = array<i64: 1, 1, 8>}, {transform_indices = @transform_3, window_bounds = array<i64: 1, 1, 8>}, {pipeline_mode = #tpu.pipeline_mode<synchronous>, transform_indices = @transform_4, window_bounds = array<i64: 2, 32, 96>}, {pipeline_mode = #tpu.pipeline_mode<synchronous>, transform_indices = @transform_5, window_bounds = array<i64: 2, 32, 32>}, {pipeline_mode = #tpu.pipeline_mode<synchronous>, transform_indices = @transform_6, window_bounds = array<i64: 2, 32, 64>}, {pipeline_mode = #tpu.pipeline_mode<synchronous>, transform_indices = @transform_7, window_bounds = array<i64: 2, 64, 32>}, {pipeline_mode = #tpu.pipeline_mode<synchronous>, transform_indices = @transform_8, window_bounds = array<i64: 1, 32>}, {transform_indices = @transform_9, window_bounds = array<i64: 1, 1, 32>}]} {
    %c0 = arith.constant 0 : index
    %c0_0 = arith.constant 0 : index
    %c0_1 = arith.constant 0 : index
    %0 = vector.load %arg1[%c0, %c0_0, %c0_1] : memref<1x8x32xf32, #tpu.memory_space<vmem>>, vector<1x8x32xf32>
    %1 = vector.shape_cast %0 : vector<1x8x32xf32> to vector<8x32xf32>
    %c0_2 = arith.constant 0 : index
    %c0_3 = arith.constant 0 : index
    %c0_4 = arith.constant 0 : index
    %2 = vector.load %arg2[%c0_2, %c0_3, %c0_4] : memref<4x8x8xf32, #tpu.memory_space<vmem>>, vector<4x8x8xf32>
    %c0_5 = arith.constant 0 : index
    %c0_6 = arith.constant 0 : index
    %c0_7 = arith.constant 0 : index
    %3 = vector.load %arg3[%c0_5, %c0_6, %c0_7] : memref<1x1x8xf32, #tpu.memory_space<vmem>>, vector<1x1x8xf32>
    %4 = vector.shape_cast %3 : vector<1x1x8xf32> to vector<1x8xf32>
    %5 = vector.shape_cast %4 : vector<1x8xf32> to vector<1x1x8xf32>
    %6 = vector.broadcast %5 : vector<1x1x8xf32> to vector<4x8x8xf32>
    %7 = arith.addf %2, %6 : vector<4x8x8xf32>
    %8 = arith.mulf %1, %1 : vector<8x32xf32>
    %cst = arith.constant dense<0.000000e+00> : vector<8xf32>
    %9 = vector.multi_reduction <add>, %8, %cst [1] : vector<8x32xf32> to vector<8xf32>
    %10 = vector.shape_cast %9 : vector<8xf32> to vector<8x1xf32>
    %cst_8 = arith.constant 3.200000e+01 : f32
    %11 = vector.broadcast %cst_8 : f32 to vector<8x1xf32>
    %12 = arith.divf %10, %11 : vector<8x1xf32>
    %cst_9 = arith.constant 9.99999997E-7 : f32
    %13 = vector.broadcast %cst_9 : f32 to vector<8x1xf32>
    %14 = arith.addf %12, %13 : vector<8x1xf32>
    %15 = math.rsqrt %14 : vector<8x1xf32>
    %16 = vector.broadcast %15 : vector<8x1xf32> to vector<8x32xf32>
    %17 = arith.mulf %1, %16 : vector<8x32xf32>
    %c0_10 = arith.constant 0 : index
    %c0_11 = arith.constant 0 : index
    %c0_12 = arith.constant 0 : index
    %18 = vector.load %arg5[%c0_10, %c0_11, %c0_12] : memref<2x32x96xf32, #tpu.memory_space<vmem>>, vector<1x32x96xf32>
    %19 = vector.shape_cast %18 : vector<1x32x96xf32> to vector<32x96xf32>
    %cst_13 = arith.constant dense<0.000000e+00> : vector<8x96xf32>
    %20 = tpu.matmul %17, %19, %cst_13 {dimension_numbers = #tpu.dot_dimension_numbers<[1], [0], [0], [1], [0, 0, 1, 1], [], []>} : vector<8x32xf32>, vector<32x96xf32>, vector<8x96xf32> -> vector<8x96xf32>
    %21 = vector.extract_strided_slice %20 {offsets = [0, 0], sizes = [8, 32], strides = [1, 1]} : vector<8x96xf32> to vector<8x32xf32>
    %22 = vector.shape_cast %21 : vector<8x32xf32> to vector<8x4x8xf32>
    %23 = vector.extract_strided_slice %20 {offsets = [0, 32], sizes = [8, 32], strides = [1, 1]} : vector<8x96xf32> to vector<8x32xf32>
    %24 = vector.shape_cast %23 : vector<8x32xf32> to vector<8x4x8xf32>
    %25 = vector.extract_strided_slice %20 {offsets = [0, 64], sizes = [8, 32], strides = [1, 1]} : vector<8x96xf32> to vector<8x32xf32>
    %26 = vector.shape_cast %25 : vector<8x32xf32> to vector<8x4x8xf32>
    "tpu.trace_start"() <{level = 10 : i32, message = "qhd,khd->hqk"}> : () -> ()
    %cst_14 = arith.constant dense<0.000000e+00> : vector<4x8x8xf32>
    %27 = tpu.matmul %22, %24, %cst_14 {dimension_numbers = #tpu.dot_dimension_numbers<[2], [2], [0], [0], [0, 1, 0, 0, 1, 0], [1], [1]>} : vector<8x4x8xf32>, vector<8x4x8xf32>, vector<4x8x8xf32> -> vector<4x8x8xf32>
    "tpu.trace_stop"() : () -> ()
    %28 = arith.addf %27, %7 : vector<4x8x8xf32>
    %cst_15 = arith.constant dense<0xFF800000> : vector<4x8xf32>
    %29 = vector.multi_reduction <maximumf>, %28, %cst_15 [2] : vector<4x8x8xf32> to vector<4x8xf32>
    %30 = vector.shape_cast %29 : vector<4x8xf32> to vector<4x8x1xf32>
    %31 = vector.broadcast %30 : vector<4x8x1xf32> to vector<4x8x8xf32>
    %32 = arith.subf %28, %31 : vector<4x8x8xf32>
    %33 = math.exp %32 : vector<4x8x8xf32>
    %cst_16 = arith.constant dense<0.000000e+00> : vector<4x8xf32>
    %34 = vector.multi_reduction <add>, %33, %cst_16 [2] : vector<4x8x8xf32> to vector<4x8xf32>
    %35 = vector.shape_cast %34 : vector<4x8xf32> to vector<4x8x1xf32>
    %36 = tpu.reciprocal %35 {approx = true} : vector<4x8x1xf32> -> vector<4x8x1xf32>
    %37 = vector.broadcast %36 : vector<4x8x1xf32> to vector<4x8x8xf32>
    %38 = arith.mulf %33, %37 : vector<4x8x8xf32>
    "tpu.trace_start"() <{level = 10 : i32, message = "hqk,khd->qhd"}> : () -> ()
    %cst_17 = arith.constant dense<0.000000e+00> : vector<4x8x8xf32>
    %39 = tpu.matmul %26, %38, %cst_17 {dimension_numbers = #tpu.dot_dimension_numbers<[0], [2], [2], [1], [0, 1, 0, 2, 1, 1], [1], [0]>} : vector<8x4x8xf32>, vector<4x8x8xf32>, vector<4x8x8xf32> -> vector<4x8x8xf32>
    %40 = tpu.transpose %39, [2, 0, 1] : vector<4x8x8xf32> -> vector<8x4x8xf32>
    "tpu.trace_stop"() : () -> ()
    %41 = vector.shape_cast %40 : vector<8x4x8xf32> to vector<8x32xf32>
    %c0_18 = arith.constant 0 : index
    %c0_19 = arith.constant 0 : index
    %c0_20 = arith.constant 0 : index
    %42 = vector.load %arg6[%c0_18, %c0_19, %c0_20] : memref<2x32x32xf32, #tpu.memory_space<vmem>>, vector<1x32x32xf32>
    %43 = vector.shape_cast %42 : vector<1x32x32xf32> to vector<32x32xf32>
    %cst_21 = arith.constant dense<0.000000e+00> : vector<8x32xf32>
    %44 = tpu.matmul %41, %43, %cst_21 {dimension_numbers = #tpu.dot_dimension_numbers<[1], [0], [0], [1], [0, 0, 1, 1], [], []>} : vector<8x32xf32>, vector<32x32xf32>, vector<8x32xf32> -> vector<8x32xf32>
    %45 = arith.addf %1, %44 : vector<8x32xf32>
    %46 = arith.mulf %45, %45 : vector<8x32xf32>
    %cst_22 = arith.constant dense<0.000000e+00> : vector<8xf32>
    %47 = vector.multi_reduction <add>, %46, %cst_22 [1] : vector<8x32xf32> to vector<8xf32>
    %48 = vector.shape_cast %47 : vector<8xf32> to vector<8x1xf32>
    %cst_23 = arith.constant 3.200000e+01 : f32
    %49 = vector.broadcast %cst_23 : f32 to vector<8x1xf32>
    %50 = arith.divf %48, %49 : vector<8x1xf32>
    %cst_24 = arith.constant 9.99999997E-7 : f32
    %51 = vector.broadcast %cst_24 : f32 to vector<8x1xf32>
    %52 = arith.addf %50, %51 : vector<8x1xf32>
    %53 = math.rsqrt %52 : vector<8x1xf32>
    %54 = vector.broadcast %53 : vector<8x1xf32> to vector<8x32xf32>
    %55 = arith.mulf %45, %54 : vector<8x32xf32>
    %c0_25 = arith.constant 0 : index
    %c0_26 = arith.constant 0 : index
    %c0_27 = arith.constant 0 : index
    %56 = vector.load %arg7[%c0_25, %c0_26, %c0_27] : memref<2x32x64xf32, #tpu.memory_space<vmem>>, vector<1x32x64xf32>
    %57 = vector.shape_cast %56 : vector<1x32x64xf32> to vector<32x64xf32>
    %cst_28 = arith.constant dense<0.000000e+00> : vector<8x64xf32>
    %58 = tpu.matmul %55, %57, %cst_28 {dimension_numbers = #tpu.dot_dimension_numbers<[1], [0], [0], [1], [0, 0, 1, 1], [], []>} : vector<8x32xf32>, vector<32x64xf32>, vector<8x64xf32> -> vector<8x64xf32>
    %cst_29 = arith.constant 0.000000e+00 : f32
    %59 = vector.broadcast %cst_29 : f32 to vector<8x64xf32>
    %60 = arith.maximumf %58, %59 : vector<8x64xf32>
    %c0_30 = arith.constant 0 : index
    %c0_31 = arith.constant 0 : index
    %c0_32 = arith.constant 0 : index
    %61 = vector.load %arg8[%c0_30, %c0_31, %c0_32] : memref<2x64x32xf32, #tpu.memory_space<vmem>>, vector<1x64x32xf32>
    %62 = vector.shape_cast %61 : vector<1x64x32xf32> to vector<64x32xf32>
    %cst_33 = arith.constant dense<0.000000e+00> : vector<8x32xf32>
    %63 = tpu.matmul %60, %62, %cst_33 {dimension_numbers = #tpu.dot_dimension_numbers<[1], [0], [0], [1], [0, 0, 1, 1], [], []>} : vector<8x64xf32>, vector<64x32xf32>, vector<8x32xf32> -> vector<8x32xf32>
    %64 = arith.addf %45, %63 : vector<8x32xf32>
    %65 = arith.mulf %64, %64 : vector<8x32xf32>
    %cst_34 = arith.constant dense<0.000000e+00> : vector<8xf32>
    %66 = vector.multi_reduction <add>, %65, %cst_34 [1] : vector<8x32xf32> to vector<8xf32>
    %67 = vector.shape_cast %66 : vector<8xf32> to vector<8x1xf32>
    %cst_35 = arith.constant 3.200000e+01 : f32
    %68 = vector.broadcast %cst_35 : f32 to vector<8x1xf32>
    %69 = arith.divf %67, %68 : vector<8x1xf32>
    %cst_36 = arith.constant 9.99999997E-7 : f32
    %70 = vector.broadcast %cst_36 : f32 to vector<8x1xf32>
    %71 = arith.addf %69, %70 : vector<8x1xf32>
    %72 = math.rsqrt %71 : vector<8x1xf32>
    %73 = vector.broadcast %72 : vector<8x1xf32> to vector<8x32xf32>
    %74 = arith.mulf %64, %73 : vector<8x32xf32>
    %c1 = arith.constant 1 : index
    %c0_37 = arith.constant 0 : index
    %c0_38 = arith.constant 0 : index
    %75 = vector.load %arg5[%c1, %c0_37, %c0_38] : memref<2x32x96xf32, #tpu.memory_space<vmem>>, vector<1x32x96xf32>
    %76 = vector.shape_cast %75 : vector<1x32x96xf32> to vector<32x96xf32>
    %cst_39 = arith.constant dense<0.000000e+00> : vector<8x96xf32>
    %77 = tpu.matmul %74, %76, %cst_39 {dimension_numbers = #tpu.dot_dimension_numbers<[1], [0], [0], [1], [0, 0, 1, 1], [], []>} : vector<8x32xf32>, vector<32x96xf32>, vector<8x96xf32> -> vector<8x96xf32>
    %78 = vector.extract_strided_slice %77 {offsets = [0, 0], sizes = [8, 32], strides = [1, 1]} : vector<8x96xf32> to vector<8x32xf32>
    %79 = vector.shape_cast %78 : vector<8x32xf32> to vector<8x4x8xf32>
    %80 = vector.extract_strided_slice %77 {offsets = [0, 32], sizes = [8, 32], strides = [1, 1]} : vector<8x96xf32> to vector<8x32xf32>
    %81 = vector.shape_cast %80 : vector<8x32xf32> to vector<8x4x8xf32>
    %82 = vector.extract_strided_slice %77 {offsets = [0, 64], sizes = [8, 32], strides = [1, 1]} : vector<8x96xf32> to vector<8x32xf32>
    %83 = vector.shape_cast %82 : vector<8x32xf32> to vector<8x4x8xf32>
    "tpu.trace_start"() <{level = 10 : i32, message = "qhd,khd->hqk"}> : () -> ()
    %cst_40 = arith.constant dense<0.000000e+00> : vector<4x8x8xf32>
    %84 = tpu.matmul %79, %81, %cst_40 {dimension_numbers = #tpu.dot_dimension_numbers<[2], [2], [0], [0], [0, 1, 0, 0, 1, 0], [1], [1]>} : vector<8x4x8xf32>, vector<8x4x8xf32>, vector<4x8x8xf32> -> vector<4x8x8xf32>
    "tpu.trace_stop"() : () -> ()
    %85 = arith.addf %84, %7 : vector<4x8x8xf32>
    %cst_41 = arith.constant dense<0xFF800000> : vector<4x8xf32>
    %86 = vector.multi_reduction <maximumf>, %85, %cst_41 [2] : vector<4x8x8xf32> to vector<4x8xf32>
    %87 = vector.shape_cast %86 : vector<4x8xf32> to vector<4x8x1xf32>
    %88 = vector.broadcast %87 : vector<4x8x1xf32> to vector<4x8x8xf32>
    %89 = arith.subf %85, %88 : vector<4x8x8xf32>
    %90 = math.exp %89 : vector<4x8x8xf32>
    %cst_42 = arith.constant dense<0.000000e+00> : vector<4x8xf32>
    %91 = vector.multi_reduction <add>, %90, %cst_42 [2] : vector<4x8x8xf32> to vector<4x8xf32>
    %92 = vector.shape_cast %91 : vector<4x8xf32> to vector<4x8x1xf32>
    %93 = tpu.reciprocal %92 {approx = true} : vector<4x8x1xf32> -> vector<4x8x1xf32>
    %94 = vector.broadcast %93 : vector<4x8x1xf32> to vector<4x8x8xf32>
    %95 = arith.mulf %90, %94 : vector<4x8x8xf32>
    "tpu.trace_start"() <{level = 10 : i32, message = "hqk,khd->qhd"}> : () -> ()
    %cst_43 = arith.constant dense<0.000000e+00> : vector<4x8x8xf32>
    %96 = tpu.matmul %83, %95, %cst_43 {dimension_numbers = #tpu.dot_dimension_numbers<[0], [2], [2], [1], [0, 1, 0, 2, 1, 1], [1], [0]>} : vector<8x4x8xf32>, vector<4x8x8xf32>, vector<4x8x8xf32> -> vector<4x8x8xf32>
    %97 = tpu.transpose %96, [2, 0, 1] : vector<4x8x8xf32> -> vector<8x4x8xf32>
    "tpu.trace_stop"() : () -> ()
    %98 = vector.shape_cast %97 : vector<8x4x8xf32> to vector<8x32xf32>
    %c1_44 = arith.constant 1 : index
    %c0_45 = arith.constant 0 : index
    %c0_46 = arith.constant 0 : index
    %99 = vector.load %arg6[%c1_44, %c0_45, %c0_46] : memref<2x32x32xf32, #tpu.memory_space<vmem>>, vector<1x32x32xf32>
    %100 = vector.shape_cast %99 : vector<1x32x32xf32> to vector<32x32xf32>
    %cst_47 = arith.constant dense<0.000000e+00> : vector<8x32xf32>
    %101 = tpu.matmul %98, %100, %cst_47 {dimension_numbers = #tpu.dot_dimension_numbers<[1], [0], [0], [1], [0, 0, 1, 1], [], []>} : vector<8x32xf32>, vector<32x32xf32>, vector<8x32xf32> -> vector<8x32xf32>
    %102 = arith.addf %64, %101 : vector<8x32xf32>
    %103 = arith.mulf %102, %102 : vector<8x32xf32>
    %cst_48 = arith.constant dense<0.000000e+00> : vector<8xf32>
    %104 = vector.multi_reduction <add>, %103, %cst_48 [1] : vector<8x32xf32> to vector<8xf32>
    %105 = vector.shape_cast %104 : vector<8xf32> to vector<8x1xf32>
    %cst_49 = arith.constant 3.200000e+01 : f32
    %106 = vector.broadcast %cst_49 : f32 to vector<8x1xf32>
    %107 = arith.divf %105, %106 : vector<8x1xf32>
    %cst_50 = arith.constant 9.99999997E-7 : f32
    %108 = vector.broadcast %cst_50 : f32 to vector<8x1xf32>
    %109 = arith.addf %107, %108 : vector<8x1xf32>
    %110 = math.rsqrt %109 : vector<8x1xf32>
    %111 = vector.broadcast %110 : vector<8x1xf32> to vector<8x32xf32>
    %112 = arith.mulf %102, %111 : vector<8x32xf32>
    %c1_51 = arith.constant 1 : index
    %c0_52 = arith.constant 0 : index
    %c0_53 = arith.constant 0 : index
    %113 = vector.load %arg7[%c1_51, %c0_52, %c0_53] : memref<2x32x64xf32, #tpu.memory_space<vmem>>, vector<1x32x64xf32>
    %114 = vector.shape_cast %113 : vector<1x32x64xf32> to vector<32x64xf32>
    %cst_54 = arith.constant dense<0.000000e+00> : vector<8x64xf32>
    %115 = tpu.matmul %112, %114, %cst_54 {dimension_numbers = #tpu.dot_dimension_numbers<[1], [0], [0], [1], [0, 0, 1, 1], [], []>} : vector<8x32xf32>, vector<32x64xf32>, vector<8x64xf32> -> vector<8x64xf32>
    %cst_55 = arith.constant 0.000000e+00 : f32
    %116 = vector.broadcast %cst_55 : f32 to vector<8x64xf32>
    %117 = arith.maximumf %115, %116 : vector<8x64xf32>
    %c1_56 = arith.constant 1 : index
    %c0_57 = arith.constant 0 : index
    %c0_58 = arith.constant 0 : index
    %118 = vector.load %arg8[%c1_56, %c0_57, %c0_58] : memref<2x64x32xf32, #tpu.memory_space<vmem>>, vector<1x64x32xf32>
    %119 = vector.shape_cast %118 : vector<1x64x32xf32> to vector<64x32xf32>
    %cst_59 = arith.constant dense<0.000000e+00> : vector<8x32xf32>
    %120 = tpu.matmul %117, %119, %cst_59 {dimension_numbers = #tpu.dot_dimension_numbers<[1], [0], [0], [1], [0, 0, 1, 1], [], []>} : vector<8x64xf32>, vector<64x32xf32>, vector<8x32xf32> -> vector<8x32xf32>
    %121 = arith.addf %102, %120 : vector<8x32xf32>
    %122 = arith.mulf %121, %121 : vector<8x32xf32>
    %cst_60 = arith.constant dense<0.000000e+00> : vector<8xf32>
    %123 = vector.multi_reduction <add>, %122, %cst_60 [1] : vector<8x32xf32> to vector<8xf32>
    %124 = vector.shape_cast %123 : vector<8xf32> to vector<8x1xf32>
    %cst_61 = arith.constant 3.200000e+01 : f32
    %125 = vector.broadcast %cst_61 : f32 to vector<8x1xf32>
    %126 = arith.divf %124, %125 : vector<8x1xf32>
    %cst_62 = arith.constant 9.99999997E-7 : f32
    %127 = vector.broadcast %cst_62 : f32 to vector<8x1xf32>
    %128 = arith.addf %126, %127 : vector<8x1xf32>
    %129 = math.rsqrt %128 : vector<8x1xf32>
    %130 = vector.broadcast %129 : vector<8x1xf32> to vector<8x32xf32>
    %131 = arith.mulf %121, %130 : vector<8x32xf32>
    %c0_63 = arith.constant 0 : index
    %c0_64 = arith.constant 0 : index
    %c0_65 = arith.constant 0 : index
    %132 = vector.load %arg4[%c0_63, %c0_64, %c0_65] : memref<1x1x8xf32, #tpu.memory_space<vmem>>, vector<1x1x8xf32>
    %133 = vector.shape_cast %132 : vector<1x1x8xf32> to vector<1x8xf32>
    %cst_66 = arith.constant dense<0.000000e+00> : vector<1x32xf32>
    %134 = tpu.matmul %133, %131, %cst_66 {dimension_numbers = #tpu.dot_dimension_numbers<[1], [0], [0], [1], [0, 0, 1, 1], [], []>} : vector<1x8xf32>, vector<8x32xf32>, vector<1x32xf32> -> vector<1x32xf32>
    %c0_67 = arith.constant 0 : index
    %c0_68 = arith.constant 0 : index
    %135 = vector.load %arg9[%c0_67, %c0_68] : memref<1x32xf32, #tpu.memory_space<vmem>>, vector<1x32xf32>
    %136 = arith.mulf %134, %135 : vector<1x32xf32>
    %c0_69 = arith.constant 0 : index
    %c0_70 = arith.constant 0 : index
    %c0_71 = arith.constant 0 : index
    %137 = vector.load %arg10[%c0_69, %c0_70, %c0_71] : memref<1x1x32xf32, #tpu.memory_space<vmem>>, vector<1x1x32xf32>
    %138 = vector.shape_cast %137 : vector<1x1x32xf32> to vector<1x32xf32>
    %139 = vector.shape_cast %136 : vector<1x32xf32> to vector<1x1x32xf32>
    tpu.vector_store %arg10[%c0_69, %c0_70, %c0_71], %139 {strides = array<i32>} : memref<1x1x32xf32, #tpu.memory_space<vmem>>, vector<1x1x32xf32>,
    return
  }
  func.func @transform_0(%arg0: i32) -> (i32, i32, i32) {
    %c0_i32 = arith.constant 0 : i32
    %c0_i32_0 = arith.constant 0 : i32
    %c0_i32_1 = arith.constant 0 : i32
    return %arg0, %c0_i32, %c0_i32_0 : i32, i32, i32
  }
  func.func @transform_1(%arg0: i32) -> (i32, i32, i32) {
    %c0_i32 = arith.constant 0 : i32
    %c0_i32_0 = arith.constant 0 : i32
    %c0_i32_1 = arith.constant 0 : i32
    %c0_i32_2 = arith.constant 0 : i32
    return %c0_i32, %c0_i32_0, %c0_i32_1 : i32, i32, i32
  }
  func.func @transform_2(%arg0: i32) -> (i32, i32, i32) {
    %c0_i32 = arith.constant 0 : i32
    %c0_i32_0 = arith.constant 0 : i32
    %c0_i32_1 = arith.constant 0 : i32
    return %arg0, %c0_i32, %c0_i32_0 : i32, i32, i32
  }
  func.func @transform_3(%arg0: i32) -> (i32, i32, i32) {
    %c0_i32 = arith.constant 0 : i32
    %c0_i32_0 = arith.constant 0 : i32
    %c0_i32_1 = arith.constant 0 : i32
    return %arg0, %c0_i32, %c0_i32_0 : i32, i32, i32
  }
  func.func @transform_4(%arg0: i32) -> (i32, i32, i32) {
    %c0_i32 = arith.constant 0 : i32
    %c0_i32_0 = arith.constant 0 : i32
    %c0_i32_1 = arith.constant 0 : i32
    %c0_i32_2 = arith.constant 0 : i32
    return %c0_i32, %c0_i32_0, %c0_i32_1 : i32, i32, i32
  }
  func.func @transform_5(%arg0: i32) -> (i32, i32, i32) {
    %c0_i32 = arith.constant 0 : i32
    %c0_i32_0 = arith.constant 0 : i32
    %c0_i32_1 = arith.constant 0 : i32
    %c0_i32_2 = arith.constant 0 : i32
    return %c0_i32, %c0_i32_0, %c0_i32_1 : i32, i32, i32
  }
  func.func @transform_6(%arg0: i32) -> (i32, i32, i32) {
    %c0_i32 = arith.constant 0 : i32
    %c0_i32_0 = arith.constant 0 : i32
    %c0_i32_1 = arith.constant 0 : i32
    %c0_i32_2 = arith.constant 0 : i32
    return %c0_i32, %c0_i32_0, %c0_i32_1 : i32, i32, i32
  }
  func.func @transform_7(%arg0: i32) -> (i32, i32, i32) {
    %c0_i32 = arith.constant 0 : i32
    %c0_i32_0 = arith.constant 0 : i32
    %c0_i32_1 = arith.constant 0 : i32
    %c0_i32_2 = arith.constant 0 : i32
    return %c0_i32, %c0_i32_0, %c0_i32_1 : i32, i32, i32
  }
  func.func @transform_8(%arg0: i32) -> (i32, i32) {
    %c0_i32 = arith.constant 0 : i32
    %c0_i32_0 = arith.constant 0 : i32
    %c0_i32_1 = arith.constant 0 : i32
    return %c0_i32, %c0_i32_0 : i32, i32
  }
  func.func @transform_9(%arg0: i32) -> (i32, i32, i32) {
    %c0_i32 = arith.constant 0 : i32
    %c0_i32_0 = arith.constant 0 : i32
    %c0_i32_1 = arith.constant 0 : i32
    return %arg0, %c0_i32, %c0_i32_0 : i32, i32, i32
  }
}

</mosaic_0001>

<bundles_post_ra>
// kernel: t5_encoder_mean_pool.1
= control target key start
LH: loop header
LB: loop body
LE: loop exit
PB: predicated region body
PF: predicated region fallthrough
CT: control target
= control target key end

     0   :  { %14 = vsyncpa [#allocation3], 0  ;;  %s3112_s0 = inlined_call_operand.vmem [shape: f32[2,8,32], index: 0, kind: input, shape index: {}]   ;;  %s3113_s1 = inlined_call_operand.vmem [shape: f32[4,8,8], index: 1, kind: input, shape index: {}]   ;;  %s3114_s2 = inlined_call_operand.vmem [shape: f32[2,1,8], index: 2, kind: input, shape index: {}]   ;;  %s3115_s3 = inlined_call_operand.vmem [shape: f32[2,1,8], index: 3, kind: input, shape index: {}]   ;;  %s3116_s4 = inlined_call_operand.vmem [shape: f32[2,32,96], index: 4, kind: input, shape index: {}]   ;;  %s3117_s5 = inlined_call_operand.vmem [shape: f32[2,32,32], index: 5, kind: input, shape index: {}]   ;;  %s3118_s6 = inlined_call_operand.vmem [shape: f32[2,32,64], index: 6, kind: input, shape index: {}]   ;;  %s3119_s7 = inlined_call_operand.vmem [shape: f32[2,64,32], index: 7, kind: input, shape index: {}]   ;;  %s3120_s8 = inlined_call_operand.vmem [shape: f32[1,32], index: 8, kind: input, shape index: {}]   ;;  %s3121_s9 = inlined_call_operand.hbm [shape: f32[2,1,32], index: 9, kind: output, shape index: {}]  }
   0x1   :  { %16 = vsyncpa [#allocation3 + $0x1], 0  ;;  %s2671_s30 = smov 0   ;;  %s2673_s10 = smov 0  }
   0x2   :  { %s2675_s11 = smov 0   ;;  %s2677_s12 = smov 0  }
   0x3 LB: > { %s2692_s13 = sadd.s32 4294967295, %s2608_s12   ;;  %s2366_s14 = sadd.s32 4294967294, %s2608_s12   ;;  %s2608_s12 = sphi %s2677_s12, %s3143_s12   ;;  %s2604_s11 = sphi %s2675_s11, %s3142_s11   ;;  %s2600_s10 = sphi %s2673_s10, %s3141_s10   ;;  %s2596_s30 = sphi %s2671_s30, %s3140_s30  }
   0x4   : > { %s2696_s15 = sadd.s32 1, %s2608_s12   ;;  %s233_s16 = sadd.s32 1, %s2604_s11 }
   0x5   : > { %s230_s17 = ssub.s32 %s2608_s12, %s2696_s15  ;;  %p243_p0 = scmp.ne.s32.totalorder %s2604_s11, %s2600_s10 }
   0x6   : > { %p231_p1 = scmp.eq.s32.totalorder %s230_s17, 0  ;;  %p244_p2 = scmp.eq.s32.totalorder %s2692_s13, 1 }
   0x7   : > { %p249_p3 = scmp.ne.s32.totalorder %s2600_s10, %s2596_s30  ;;  %p250_p4 = scmp.eq.s32.totalorder %s2366_s14, 1 }
   0x8   : > { %s2707_s18 = scalar_select %p231_p1, %s2604_s11, %s233_s16  }
   0x9   : > { %p2709_p5 = por %p244_p2, %p243_p0  ;;  %p2713_p6 = por %p250_p4, %p249_p3 }
   0xa   : > { %p2369_p7 = scmp.ge.s32.totalorder %s2608_s12, 1  ;;  %p305_p8 = scmp.lt.s32.totalorder %s2608_s12, 3 }
   0xc   : > { %p306_p9 = pnand %p2369_p7, %p305_p8 }
   0xd   : > { %p345_p10 = scmp.lt.s32.totalorder (!%p306_p9), %s2692_s13, 1  ;;  %s3122_s23 = smov (!%p306_p9), 96  }
   0xe   : > { %309 = sbr.rel (%p306_p9) target bundleno = 4631 (0x1217), region = 56  ;;  %s3128_s24 = smov (!%p306_p9), 112  }
   0xf   : > { %s2614_s26 = smov (!%p306_p9), 104   ;;  %s3125_s14 = smov (!%p306_p9), 64  }
  0x10   : > { %s3127_s17 = smov (!%p306_p9), 16   ;;  %s3135_s27 = smov (!%p306_p9), 96  }
  0x11   : > { %s3137_s28 = smov (!%p306_p9), 24   ;;  %s3139_s16 = smov (!%p306_p9), 8  }
  0x13   : > { %s2721_s21 = scalar_select %p345_p10, %s2692_s13, 1  ;;  %vm369_vm0 = vcmask 261120   ;;  %v2610_v3 = vmov 32.0   ;;  %v396_v6 = vld [vmem:[%s3116_s4 + $0x18] sm:$0xff]  ;;  %v395_v8 = vld [vmem:[%s3116_s4 + $0x10] sm:$0xff]  ;;  %v394_v9 = vld [vmem:[%s3116_s4 + $0x8] sm:$0xff] }
  0x14   : > { %2502 = vrcp.f32 %v2610_v3  ;;  %412 = vmatpush.msra.mxu0 %v396_v6  ;;  %v393_v10 = vld [vmem:[%s3116_s4] sm:$0xff]  ;;  %vm567_vm5 = vcmask 64512   ;;  %v357_v44 = vld [vmem:[%s3113_s1 + $0x8] sm:$0xff]  ;;  %v358_v45 = vld [vmem:[%s3113_s1 + $0x10] sm:$0xff]  ;;  %vm1073_vm6 = vcmask 1047556   ;;  %vm1196_vm7 = vcmask 130048  }
  0x15   : > { %s2370_s22 = sshll.u32 %s2721_s21, 3  ;;  %s351_s29 = scalar_lea.vmem %s3114_s2, %s2721_s21  ;;  %v356_v39 = vld [vmem:[%s3113_s1] sm:$0xff]  ;;  %v359_v54 = vld [vmem:[%s3113_s1 + $0x18] sm:$0xff]  ;;  %vm1198_vm8 = vcmask 195584   ;;  %vm1281_vm12 = vcmask 523264  }
  0x16   : > { %s348_s25 = scalar_lea.vmem %s3112_s0, %s2370_s22  ;;  %413 = vmatpush.msra.mxu0 %v395_v8  ;;  %v2501_v38 = vld [vmem:[%s351_s29] ss:$0 sm:$0xff]  ;;  %s3129_s22 = smov 8  }
  0x17   : > { %v2727_v0 = vld [vmem:[%s348_s25] sm:$0xff]  ;;  %s3130_s25 = smov 120   ;;  %v2771_v40 = vadd.f32 %v2501_v38, %v356_v39  ;;  %v2781_v46 = vadd.f32 %v2501_v38, %v357_v44  ;;  %v2783_v47 = vadd.f32 %v2501_v38, %v358_v45  ;;  %v2792_v55 = vadd.f32 %v2501_v38, %v359_v54  ;;  %s3138_s29 = smov 16  }
  0x18   : > { %v368_v1 = vmul.f32 %v2727_v0, %v2727_v0  ;;  %414 = vmatpush.msra.mxu0 %v394_v9  ;;  %v2616_v44 = vmov 1983009808   ;;  %v2617_v54 = vmov 1934713408  }
  0x19   : > { %v1078_v45 = vunpack.c.l.s4 %v2616_v44 }
  0x1a   : > { %v370_v2 = vsel %vm369_vm0, %v368_v1, 0.0  ;;  %v2503_v4 = vpop.eup %2502  ;;  %415 = vmatpush.msra.mxu0 %v393_v10 }
  0x1b   : > { %371 = vadd.xlane.f32.xlu0 %v370_v2  ;;  %v374_v5 = vmul.f32 32.0, %v2503_v4  ;;  %vm378_vm1 = vweird.f32 %v2503_v4 }
  0x1d   : > { %v375_v7 = vsub.f32 1.0, %v374_v5 }
  0x1f   : > { %v376_v11 = vmul.f32 %v2503_v4, %v375_v7 }
  0x21   : > { %v377_v12 = vadd.f32 %v2503_v4, %v376_v11 }
  0x23   : > { %v2744_v13 = vsel %vm378_vm1, %v2503_v4, %v377_v12 }
  0x8e   : > { %v372_v14 = vpop.xlane.xlu0 %371 }
  0x8f   : > { %v380_v15 = vmul.f32 %v2744_v13, %v372_v14 }
  0x91   : > { %v381_v16 = vadd.f32 1e-06, %v380_v15 }
  0x93   : > { %2504 = vrsqrt.f32 %v381_v16  ;;  %vm388_vm3 = vweird.f32 %v381_v16 }
  0x99   : > { %v2505_v17 = vpop.eup %2504 }
  0x9a   : > { %v383_v18 = vmul.f32 %v2505_v17, %v381_v16  ;;  %vm389_vm2 = vweird.f32 %v2505_v17 }
  0x9b   : > { %vm390_vm4 = vmor %vm388_vm3, %vm389_vm2 }
  0x9c   : > { %v384_v19 = vmul.f32 %v2505_v17, %v383_v18 }
  0x9e   : > { %v385_v20 = vmul.f32 0.5, %v384_v19 }
  0xa0   : > { %v386_v21 = vsub.f32 1.5, %v385_v20 }
  0xa2   : > { %v387_v22 = vmul.f32 %v2505_v17, %v386_v21 }
  0xa4   : > { %v391_v23 = vsel %vm390_vm4, %v2505_v17, %v387_v22 }
  0xa5   : > { %v392_v24 = vmul.f32 %v391_v23, %v2727_v0 }
  0xa7   : > { %2371 = vmatmul.msk.f32.vlgmr.msra.gmra.mxu0 %vm369_vm0, %v392_v24 }
 0x124   : > { %v417_v25 = vpop.f32.mrf.mxu0 }
 0x125   : > { %427 = vrot.lane.b32.xlu2 %v417_v25, %s3122_s23  ;;  %423 = vrot.lane.b32.xlu1 %v417_v25, %s3128_s24  ;;  %s343_s24 = sand.u32 1, %s2600_s10  }
 0x126   : > { %421 = vrot.lane.b32.xlu0 %v417_v25, %s3130_s25 }
 0x12d   : > { %425 = vrot.lane.b32.xlu1 %v417_v25, %s2614_s26 }
 0x17f   : > { %v428_v30 = vpop.permute.xlu2 %427 }
 0x197   : > { %v424_v26 = vpop.permute.xlu1 %423 }
 0x198   : > { %v2753_v27 = vpop.permute.xlu0 %421 }
 0x199   : > { %v2477_v28 = vpack.i.bf16 %v424_v26, %v2753_v27 }
 0x19b   : > { %2478 = vrot.lane.b32.xlu2 %v2477_v28, %s3122_s23 }
 0x19f   : > { %v426_v29 = vpop.permute.xlu1 %425 }
 0x1a0   : > { %433 = vrot.lane.b32.xlu1 %v426_v29, %s3122_s23  ;;  %s3124_s23 = smov 24  }
 0x1c1   : > { %439 = vxpose.xlu2.b32.start.end [1/1] (short) (narrow) %v428_v30, 8 }
 0x1f5   : > { %v2479_v31 = vpop.permute.xlu2 %2478 }
 0x1f6   : > { %2483 = vxpose.xlu1.b32.start.end [1/1] (short) (narrow) %v2479_v31, 8 }
 0x212   : > { %v434_v32 = vpop.permute.xlu1 %433 }
 0x213   : > { %535 = vxpose.xlu0.b32.start.end [1/1] (short) (narrow) %v434_v32, 8 }
 0x250   : > { %700 = vrot.lane.b32.xlu1 %v417_v25, %s3125_s14 }
 0x25a   : > { %v455_v33 = vpop.trf.xlu2 }
 0x25b   : > { %585 = vmatpush.msra.mxu3 %v455_v33 }
 0x25c   : > { %2372 = vmatmul.msk.f32.vlgmr.msra.gmra.mxu3 %vm567_vm5, %v417_v25 }
 0x29a   : > { %v2484_v34 = vpop.trf.xlu1 }
 0x29b   : > { %v2485_v35 = vunpack.i.l.bf16 %v2484_v34  ;;  %v2488_v36 = vunpack.i.h.bf16 %v2484_v34 }
 0x29d   : > { %607 = vmatpush.msra.mxu2 %v2485_v35  ;;  %629 = vmatpush.msrb.mxu3 %v2488_v36 }
 0x29e   : > { %2373 = vmatmul.msk.f32.vlgmr.msra.gmra.mxu2 %vm567_vm5, %v2753_v27  ;;  %2374 = vmatmul.msk.f32.vlgmr.msrb.gmra.mxu3 %vm567_vm5, %v424_v26 }
 0x2b7   : > { %v551_v37 = vpop.trf.xlu0 }
 0x2b8   : > { %651 = vmatpush.msra.mxu1 %v551_v37 }
 0x2b9   : > { %2375 = vmatmul.msk.f32.vlgmr.msra.gmra.mxu1 %vm567_vm5, %v426_v29 }
 0x2c2   : > { %v701_v59 = vpop.permute.xlu1 %700 }
 0x2df   : > { %v587_v41 = vpop.f32.mrf.mxu3 }
 0x2e0   : > { %v588_v42 = vadd.f32 %v587_v41, %v2771_v40 }
 0x2e2   : > { %v656_v43 = vsel %vm567_vm5, %v588_v42, -inf }
 0x2e3   : > { %657 = vmax.xlane.f32.xlu2 %v656_v43 }
 0x321   : > { %v609_v48 = vpop.f32.mrf.mxu2  ;;  %v631_v49 = vpop.f32.mrf.mxu3 }
 0x322   : > { %v610_v50 = vadd.f32 %v609_v48, %v2781_v46  ;;  %v632_v51 = vadd.f32 %v631_v49, %v2783_v47 }
 0x324   : > { %v662_v52 = vsel %vm567_vm5, %v632_v51, -inf  ;;  %v659_v53 = vsel %vm567_vm5, %v610_v50, -inf }
 0x325   : > { %663 = vmax.xlane.f32.xlu1 %v662_v52  ;;  %660 = vmax.xlane.f32.xlu0 %v659_v53 }
 0x336   : > { %v653_v56 = vpop.f32.mrf.mxu1 }
 0x337   : > { %v654_v57 = vadd.f32 %v653_v56, %v2792_v55  ;;  %v1102_v56 = vunpack.c.l.s4 %v2617_v54 }
 0x339   : > { %v665_v58 = vsel %vm567_vm5, %v654_v57, -inf }
 0x33a   : > { %666 = vmax.xlane.f32.xlu2 %v665_v58 }
 0x33e   : > { %706 = vrot.lane.b32.xlu1 %v426_v29, %s3125_s14 }
 0x34e   : > { %712 = vxpose.xlu0.b32.start.end [1/1] (short) (narrow) %v701_v59, 8 }
 0x352   : > { %704 = vrot.lane.b32.xlu2 %v424_v26, %s3125_s14 }
 0x356   : > { %v658_v60 = vpop.xlane.xlu2 %657 }
 0x357   : > { %v668_v61 = vsub.f32 %v588_v42, %v658_v60 }
 0x359   : > { %v672_v62 = vmul.f32 1.442695, %v668_v61  ;;  %v2818_v61 = vunpack.c.0.s8 %v1102_v56 }
 0x35b   : > { %2506 = vpow2.f32 %v672_v62 }
 0x361   : > { %v2507_v63 = vpop.eup %2506 }
 0x362   : > { %v680_v1 = vsel %vm567_vm5, %v2507_v63, 0.0 }
 0x37b   : > { %681 = vadd.xlane.f32.xlu2 %v680_v1 }
 0x398   : > { %v664_v2 = vpop.xlane.xlu1 %663  ;;  %v661_v12 = vpop.xlane.xlu0 %660 }
 0x399   : > { %v670_v3 = vsub.f32 %v632_v51, %v664_v2  ;;  %v669_v14 = vsub.f32 %v610_v50, %v661_v12  ;;  %v2812_v51 = vunpack.c.0.s8 %v1078_v45 }
 0x39b   : > { %v676_v4 = vmul.f32 1.442695, %v670_v3  ;;  %v674_v15 = vmul.f32 1.442695, %v669_v14 }
 0x39d   : > { %2508 = vpow2.f32 %v676_v4 }
 0x3a3   : > { %v2509_v5 = vpop.eup %2508 }
 0x3a4   : > { %v686_v6 = vsel %vm567_vm5, %v2509_v5, 0.0 }
 0x3a5   : > { %687 = vadd.xlane.f32.xlu1 %v686_v6 }
 0x3ad   : > { %v667_v7 = vpop.xlane.xlu2 %666 }
 0x3ae   : > { %v671_v8 = vsub.f32 %v654_v57, %v667_v7 }
 0x3b0   : > { %v678_v9 = vmul.f32 1.442695, %v671_v8  ;;  %v707_v23 = vpop.permute.xlu1 %706 }
 0x3b2   : > { %2510 = vpow2.f32 %v678_v9 }
 0x3b3   : > { %2512 = vpow2.f32 %v674_v15 }
 0x3b5   : > { %v705_v16 = vpop.permute.xlu2 %704 }
 0x3b8   : > { %v2511_v10 = vpop.eup %2510 }
 0x3b9   : > { %v689_v11 = vsel %vm567_vm5, %v2511_v10, 0.0  ;;  %v2513_v17 = vpop.eup %2512 }
 0x3ba   : > { %690 = vadd.xlane.f32.xlu2 %v689_v11  ;;  %v683_v18 = vsel %vm567_vm5, %v2513_v17, 0.0 }
 0x3bc   : > { %702 = vrot.lane.b32.xlu0 %v2753_v27, %s3125_s14 }
 0x3e3   : > { %776 = vxpose.xlu2.b32.start.end [1/1] (short) (narrow) %v705_v16, 8 }
 0x3e6   : > { %684 = vadd.xlane.f32.xlu0 %v683_v18 }
 0x3ee   : > { %v682_v19 = vpop.xlane.xlu2 %681 }
 0x3ef   : > { %2514 = vrcp.f32 %v682_v19 }
 0x3f2   : > { %v728_v22 = vpop.trf.xlu0 }
 0x3f5   : > { %v2515_v20 = vpop.eup %2514 }
 0x3f6   : > { %v696_v21 = vmul.f32 %v2515_v20, %v2507_v63 }
 0x3f8   : > { %2376 = vmatpush.xpose.msk.msrb.mxu2 %vm567_vm5, %v696_v21 }
 0x3fb   : > { %2377 = vmatmul.msk.f32.vlgmr.msrb.gmra.mxu2 %vm567_vm5, %v728_v22 }
 0x40f   : > { %808 = vxpose.xlu0.b32.start.end [1/1] (short) (narrow) %v707_v23, 8 }
 0x418   : > { %v688_v24 = vpop.xlane.xlu1 %687 }
 0x419   : > { %2516 = vrcp.f32 %v688_v24 }
 0x41f   : > { %v2517_v25 = vpop.eup %2516 }
 0x420   : > { %v698_v26 = vmul.f32 %v2517_v25, %v2509_v5 }
 0x422   : > { %2380 = vmatpush.xpose.msk.msrb.mxu0 %vm567_vm5, %v698_v26 }
 0x42d   : > { %v691_v27 = vpop.xlane.xlu2 %690 }
 0x42e   : > { %2518 = vrcp.f32 %v691_v27  ;;  %v703_v28 = vpop.permute.xlu0 %702 }
 0x42f   : > { %744 = vxpose.xlu1.b32.start.end [1/1] (short) (narrow) %v703_v28, 8 }
 0x434   : > { %v2519_v29 = vpop.eup %2518 }
 0x435   : > { %v699_v30 = vmul.f32 %v2519_v29, %v2511_v10 }
 0x437   : > { %2382 = vmatpush.xpose.msk.msrb.mxu1 %vm567_vm5, %v699_v30 }
 0x459   : > { %v685_v31 = vpop.xlane.xlu0 %684 }
 0x45a   : > { %2520 = vrcp.f32 %v685_v31 }
 0x460   : > { %v2521_v32 = vpop.eup %2520 }
 0x461   : > { %v697_v33 = vmul.f32 %v2521_v32, %v2513_v17 }
 0x463   : > { %2378 = vmatpush.xpose.msk.msra.mxu3 %vm567_vm5, %v697_v33 }
 0x47c   : > { %v792_v35 = vpop.trf.xlu2 }
 0x47d   : > { %2381 = vmatmul.msk.f32.vlgmr.msrb.gmra.mxu0 %vm567_vm5, %v792_v35 }
 0x47e   : > { %v863_v34 = vpop.f32.mrf.mxu2 }
 0x47f   : > { %944 = vxpose.xlu2.b32.start.end [1/1] (short) (narrow) %v863_v34, 8 }
 0x4b3   : > { %v824_v36 = vpop.trf.xlu0 }
 0x4b4   : > { %2383 = vmatmul.msk.f32.vlgmr.msrb.gmra.mxu1 %vm567_vm5, %v824_v36 }
 0x4d3   : > { %v760_v37 = vpop.trf.xlu1 }
 0x4d4   : > { %2379 = vmatmul.msk.f32.vlgmr.msra.gmra.mxu3 %vm567_vm5, %v760_v37 }
 0x4fa   : > { %v915_v39 = vpop.f32.mrf.mxu0 }
 0x518   : > { %v960_v48 = vpop.trf.xlu2 }
 0x519   : > { %v1075_v50 = vrot.slane %v960_v48, 4 }
 0x531   : > { %v941_v38 = vpop.f32.mrf.mxu1 }
 0x532   : > { %1040 = vxpose.xlu0.b32.start.end [1/1] (short) (narrow) %v941_v38, 8 }
 0x53a   : > { %1008 = vxpose.xlu0.b32.start.end [1/1] (short) (narrow) %v915_v39, 8 }
 0x557   : > { %v889_v41 = vpop.f32.mrf.mxu3 }
 0x558   : > { %976 = vxpose.xlu2.b32.start.end [1/1] (short) (narrow) %v889_v41, 8 }
 0x5d6   : > { %v1056_v42 = vpop.trf.xlu0 }
 0x5d7   : > { %v1085_v58 = vrot.slane %v1056_v42, 4 }
 0x5de   : > { %v1024_v43 = vpop.trf.xlu0 }
 0x5df   : > { %v1072_v49 = vrot.slane %v1024_v43, 4  ;;  %v1076_v53 = vsel %vm1073_vm6, %v1024_v43, %v1075_v50 }
 0x5e0   : > { %v1084_v59 = vperm.slane %v1076_v53, %v2812_v51 }
 0x5e1   : > { %v1074_v52 = vsel %vm1073_vm6, %v1072_v49, %v960_v48 }
 0x5e2   : > { %v1080_v57 = vperm.slane %v1074_v52, %v2812_v51  ;;  %v1111_v4 = vrot.slane %v1084_v59, 4 }
 0x5e4   : > { %v1099_v1 = vrot.slane %v1080_v57, 4 }
 0x5f1   : > { %v992_v60 = vpop.trf.xlu2 }
 0x5f2   : > { %v1086_v62 = vsel %vm1073_vm6, %v1085_v58, %v992_v60  ;;  %v1087_v63 = vrot.slane %v992_v60, 4  ;;  %v1203_v60 = vld [vmem:[%s3117_s5 + $0x18] sm:$0xff] }
 0x5f3   : > { %v1092_v2 = vperm.slane %v1086_v62, %v2812_v51  ;;  %1219 = vmatpush.msra.mxu2 %v1203_v60  ;;  %v1202_v62 = vld [vmem:[%s3117_s5 + $0x10] sm:$0xff] }
 0x5f4   : > { %v1088_v3 = vsel %vm1073_vm6, %v1056_v42, %v1087_v63  ;;  %v1201_v63 = vld [vmem:[%s3117_s5 + $0x8] sm:$0xff] }
 0x5f5   : > { %v1096_v5 = vperm.slane %v1088_v3, %v2812_v51  ;;  %v1097_v6 = vrot.slane %v1092_v2, 4  ;;  %v1100_v7 = vsel %vm1073_vm6, %v1092_v2, %v1099_v1  ;;  %1220 = vmatpush.msra.mxu2 %v1202_v62  ;;  %v1200_v1 = vld [vmem:[%s3117_s5] sm:$0xff] }
 0x5f6   : > { %v1108_v8 = vperm.slane %v1100_v7, %v2818_v61 }
 0x5f7   : > { %v1098_v9 = vsel %vm1073_vm6, %v1097_v6, %v1080_v57  ;;  %v1109_v10 = vrot.slane %v1096_v5, 4  ;;  %v1112_v11 = vsel %vm1073_vm6, %v1096_v5, %v1111_v4  ;;  %1221 = vmatpush.msra.mxu2 %v1201_v63 }
 0x5f8   : > { %v1104_v12 = vperm.slane %v1098_v9, %v2818_v61  ;;  %v1120_v14 = vperm.slane %v1112_v11, %v2818_v61  ;;  %v1123_v15 = vrot.slane %v1108_v8, 4 }
 0x5f9   : > { %v1110_v16 = vsel %vm1073_vm6, %v1109_v10, %v1084_v59  ;;  %1222 = vmatpush.msra.mxu2 %v1200_v1 }
 0x5fa   : > { %v1116_v17 = vperm.slane %v1110_v16, %v2818_v61  ;;  %v1121_v18 = vrot.slane %v1104_v12, 4  ;;  %v1124_v19 = vsel %vm1073_vm6, 0.0, %v1123_v15  ;;  %v1127_v20 = vrot.slane %v1120_v14, 4  ;;  %v1247_v14 = vld [vmem:[%s3118_s6 + $0x10] sm:$0xff]  ;;  %v1280_v16 = vld [vmem:[%s3119_s7 + $0x38] sm:$0xff] }
 0x5fb   : > { %v1129_v21 = vsel %vm1073_vm6, %v1123_v15, %v1104_v12  ;;  %v1134_v22 = vrot.slane %v1124_v19, 4  ;;  %v1248_v12 = vld [vmem:[%s3118_s6 + $0x18] sm:$0xff]  ;;  %v1246_v15 = vld [vmem:[%s3118_s6 + $0x8] sm:$0xff]  ;;  %1293 = vmatpush.msra.mxu0 %v1280_v16  ;;  %v1277_v19 = vld [vmem:[%s3119_s7 + $0x20] sm:$0xff] }
 0x5fc   : > { %v1122_v23 = vsel %vm1073_vm6, 0.0, %v1121_v18  ;;  %v1125_v24 = vrot.slane %v1116_v17, 4  ;;  %v1128_v25 = vsel %vm1073_vm6, 0.0, %v1127_v20  ;;  %v1133_v26 = vperm.slane %v1129_v21, %v2812_v51  ;;  %1264 = vmatpush.msrb.mxu3 %v1248_v12  ;;  %v1278_v18 = vld [vmem:[%s3119_s7 + $0x28] sm:$0xff] }
 0x5fd   : > { %v1145_v27 = vrot.slane %v1128_v25, 4  ;;  %v1135_v28 = vsel %vm1073_vm6, %v1134_v22, %v1122_v23  ;;  %v1140_v29 = vsel %vm1073_vm6, %v1127_v20, %v1116_v17  ;;  %v1279_v17 = vld [vmem:[%s3119_s7 + $0x30] sm:$0xff]  ;;  %v1276_v20 = vld [vmem:[%s3119_s7 + $0x18] sm:$0xff] }
 0x5fe   : > { %v1126_v30 = vsel %vm1073_vm6, 0.0, %v1125_v24  ;;  %v1139_v31 = vperm.slane %v1135_v28, %v2812_v51  ;;  %v1144_v32 = vperm.slane %v1140_v29, %v2812_v51  ;;  %v1153_v33 = vrot.slane %v1133_v26, 4  ;;  %1265 = vmatpush.msrb.mxu3 %v1247_v14  ;;  %1294 = vmatpush.msra.mxu0 %v1279_v17  ;;  %v1275_v23 = vld [vmem:[%s3119_s7 + $0x10] sm:$0xff] }
 0x5ff   : > { %v1146_v34 = vsel %vm1073_vm6, %v1145_v27, %v1126_v30 }
 0x600   : > { %v1150_v35 = vperm.slane %v1146_v34, %v2812_v51  ;;  %v1154_v36 = vsel %vm1073_vm6, %v1139_v31, %v1153_v33  ;;  %v1165_v37 = vrot.slane %v1144_v32, 4  ;;  %v1151_v38 = vrot.slane %v1139_v31, 4  ;;  %1266 = vmatpush.msrb.mxu3 %v1246_v15  ;;  %1295 = vmatpush.msra.mxu0 %v1278_v18  ;;  %v1274_v33 = vld [vmem:[%s3119_s7 + $0x8] sm:$0xff]  ;;  %v1273_v34 = vld [vmem:[%s3119_s7] sm:$0xff] }
 0x601   : > { %v1162_v39 = vperm.slane %v1154_v36, %v2818_v61 }
 0x602   : > { %v1166_v41 = vsel %vm1073_vm6, %v1150_v35, %v1165_v37  ;;  %v1152_v42 = vsel %vm1073_vm6, %v1151_v38, %v1133_v26  ;;  %v1163_v43 = vrot.slane %v1150_v35, 4  ;;  %1296 = vmatpush.msra.mxu0 %v1277_v19 }
 0x603   : > { %v1174_v44 = vperm.slane %v1166_v41, %v2818_v61  ;;  %v1181_v45 = vrot.slane %v1162_v39, 4  ;;  %v1158_v48 = vperm.slane %v1152_v42, %v2818_v61  ;;  %v2390_v42 = vld [vmem:[%s3116_s4 + $0x38] sm:$0xff] }
 0x604   : > { %v1164_v49 = vsel %vm1073_vm6, %v1163_v43, %v1144_v32  ;;  %1297 = vmatpush.msra.mxu0 %v1276_v20  ;;  %1343 = vmatpush.msra.mxu1 %v2390_v42  ;;  %v2389_v43 = vld [vmem:[%s3116_s4 + $0x30] sm:$0xff] }
 0x605   : > { %v1182_v50 = vsel %vm1073_vm6, %v1174_v44, %v1181_v45  ;;  %v1179_v52 = vrot.slane %v1174_v44, 4  ;;  %v1170_v53 = vperm.slane %v1164_v49, %v2818_v61  ;;  %v1177_v54 = vrot.slane %v1158_v48, 4  ;;  %v2388_v44 = vld [vmem:[%s3116_s4 + $0x28] sm:$0xff]  ;;  %v2387_v45 = vld [vmem:[%s3116_s4 + $0x20] sm:$0xff] }
 0x606   : > { %1192 = vrot.lane.b32.xlu1 %v1182_v50, %s3124_s23  ;;  %1298 = vmatpush.msra.mxu0 %v1275_v23  ;;  %s3133_s23 = smov 120  }
 0x607   : > { %v1180_v56 = vsel %vm1073_vm6, %v1179_v52, %v1162_v39  ;;  %v1175_v57 = vrot.slane %v1170_v53, 4  ;;  %v1178_v58 = vsel %vm1073_vm6, %v1170_v53, %v1177_v54  ;;  %1344 = vmatpush.msra.mxu1 %v2389_v43 }
 0x608   : > { %1188 = vrot.lane.b32.xlu2 %v1180_v56, %s3127_s17  ;;  %1184 = vrot.lane.b32.xlu0 %v1178_v58, %s3129_s22  ;;  %s3134_s17 = smov 112   ;;  %s354_s22 = scalar_lea.vmem %s3115_s3, %s2721_s21 }
 0x609   : > { %v1176_v59 = vsel %vm1073_vm6, %v1175_v57, %v1158_v48  ;;  %1299 = vmatpush.msra.mxu0 %v1274_v33  ;;  %1345 = vmatpush.msra.mxu1 %v2388_v44 }
 0x60b   : > { %1300 = vmatpush.msra.mxu0 %v1273_v34  ;;  %1346 = vmatpush.msra.mxu1 %v2387_v45 }
 0x662   : > { %v1189_v3 = vpop.permute.xlu2 %1188 }
 0x678   : > { %v1193_v5 = vpop.permute.xlu1 %1192 }
 0x67a   : > { %v1185_v2 = vpop.permute.xlu0 %1184 }
 0x67b   : > { %v1195_v4 = vsel %vm567_vm5, %v1176_v59, %v1185_v2 }
 0x67c   : > { %v1197_v6 = vsel %vm1196_vm7, %v1195_v4, %v1189_v3 }
 0x67d   : > { %v1199_v7 = vsel %vm1198_vm8, %v1197_v6, %v1193_v5 }
 0x67e   : > { %2384 = vmatmul.msk.f32.vlgmr.msra.gmra.mxu2 %vm369_vm0, %v1199_v7 }
 0x701   : > { %v1224_v8 = vpop.f32.mrf.mxu2 }
 0x702   : > { %v1227_v9 = vadd.f32 %v1224_v8, %v2727_v0  ;;  %v1245_v0 = vld [vmem:[%s3118_s6] sm:$0xff] }
 0x703   : > { %1267 = vmatpush.msrb.mxu3 %v1245_v0 }
 0x704   : > { %v1228_v10 = vmul.f32 %v1227_v9, %v1227_v9 }
 0x706   : > { %v1229_v11 = vsel %vm369_vm0, %v1228_v10, 0.0 }
 0x707   : > { %1230 = vadd.xlane.f32.xlu1 %v1229_v11 }
 0x77a   : > { %v1231_v21 = vpop.xlane.xlu1 %1230 }
 0x77b   : > { %v1232_v22 = vmul.f32 %v1231_v21, %v2744_v13 }
 0x77d   : > { %v1233_v24 = vadd.f32 1e-06, %v1232_v22 }
 0x77f   : > { %2522 = vrsqrt.f32 %v1233_v24  ;;  %vm1240_vm10 = vweird.f32 %v1233_v24 }
 0x785   : > { %v2523_v25 = vpop.eup %2522 }
 0x786   : > { %v1235_v26 = vmul.f32 %v2523_v25, %v1233_v24  ;;  %vm1241_vm9 = vweird.f32 %v2523_v25 }
 0x787   : > { %vm1242_vm11 = vmor %vm1240_vm10, %vm1241_vm9 }
 0x788   : > { %v1236_v27 = vmul.f32 %v2523_v25, %v1235_v26 }
 0x78a   : > { %v1237_v28 = vmul.f32 0.5, %v1236_v27 }
 0x78c   : > { %v1238_v29 = vsub.f32 1.5, %v1237_v28 }
 0x78e   : > { %v1239_v30 = vmul.f32 %v2523_v25, %v1238_v29 }
 0x790   : > { %v1243_v31 = vsel %vm1242_vm11, %v2523_v25, %v1239_v30 }
 0x791   : > { %v1244_v32 = vmul.f32 %v1243_v31, %v1227_v9 }
 0x793   : > { %2385 = vmatmul.msk.f32.vlgmr.msrb.gmra.mxu3 %vm369_vm0, %v1244_v32 }
 0x816   : > { %v1269_v35 = vpop.f32.mrf.mxu3 }
 0x817   : > { %v1272_v36 = vmax.f32 %v1269_v35, 0.0 }
 0x819   : > { %2386 = vmatmul.msk.f32.vlgmr.msra.gmra.mxu0 %vm1281_vm12, %v1272_v36 }
 0x896   : > { %v1302_v37 = vpop.f32.mrf.mxu0 }
 0x897   : > { %v2916_v38 = vadd.f32 %v1302_v37, %v1227_v9 }
 0x899   : > { %v1306_v39 = vmul.f32 %v2916_v38, %v2916_v38 }
 0x89b   : > { %v1307_v41 = vsel %vm369_vm0, %v1306_v39, 0.0 }
 0x89c   : > { %1308 = vadd.xlane.f32.xlu2 %v1307_v41 }
 0x90f   : > { %v1309_v48 = vpop.xlane.xlu2 %1308 }
 0x910   : > { %v1310_v49 = vmul.f32 %v1309_v48, %v2744_v13 }
 0x912   : > { %v1311_v50 = vadd.f32 1e-06, %v1310_v49 }
 0x914   : > { %2524 = vrsqrt.f32 %v1311_v50  ;;  %vm1318_vm14 = vweird.f32 %v1311_v50 }
 0x91a   : > { %v2525_v52 = vpop.eup %2524 }
 0x91b   : > { %v1313_v53 = vmul.f32 %v2525_v52, %v1311_v50  ;;  %vm1319_vm13 = vweird.f32 %v2525_v52 }
 0x91c   : > { %vm1320_vm15 = vmor %vm1318_vm14, %vm1319_vm13 }
 0x91d   : > { %v1314_v54 = vmul.f32 %v2525_v52, %v1313_v53 }
 0x91f   : > { %v1315_v56 = vmul.f32 0.5, %v1314_v54 }
 0x921   : > { %v1316_v57 = vsub.f32 1.5, %v1315_v56 }
 0x923   : > { %v1317_v58 = vmul.f32 %v2525_v52, %v1316_v57 }
 0x925   : > { %v1321_v59 = vsel %vm1320_vm15, %v2525_v52, %v1317_v58 }
 0x926   : > { %v1322_v60 = vmul.f32 %v1321_v59, %v2916_v38 }
 0x928   : > { %2391 = vmatmul.msk.f32.vlgmr.msra.gmra.mxu1 %vm369_vm0, %v1322_v60 }
 0x9a5   : > { %v1348_v62 = vpop.f32.mrf.mxu1 }
 0x9a6   : > { %1356 = vrot.lane.b32.xlu0 %v1348_v62, %s2614_s26  ;;  %s3136_s26 = smov 64  }
 0x9ae   : > { %1352 = vrot.lane.b32.xlu0 %v1348_v62, %s3133_s23  ;;  %s2566_s23 = scalar_lea.hbm %s3121_s9, 2 }
 0x9b6   : > { %1354 = vrot.lane.b32.xlu0 %v1348_v62, %s3134_s17  ;;  %s2289_s17 = scalar_lea.hbm %s3121_s9, %s2692_s13 }
 0x9b7   : > { %s2293_s21 = sshll.u32 %s2289_s17, 4  ;;  %s2294_s21 = int_to_ptr.hbm [resolvable:$true] %s2293_s21 }
 0x9b8   : > { %s2560_s25 = sshra.s32 %s2294_s21, 4  ;;  %s2561_s25 = int_to_ptr.hbm [resolvable:$true] %s2560_s25 }
 0x9b9   : > { %p2567_p0 = scmp.lt.s32.totalorder %s2561_s25, %s3121_s9 }
 0x9be   : > { %1358 = vrot.lane.b32.xlu0 %v1348_v62, %s3135_s27 }
 0xa18   : > { %v1357_v63 = vpop.permute.xlu0 %1356 }
 0xa19   : > { %1364 = vrot.lane.b32.xlu1 %v1357_v63, %s3135_s27 }
 0xa20   : > { %v1353_v1 = vpop.permute.xlu0 %1352 }
 0xa28   : > { %v1355_v2 = vpop.permute.xlu0 %1354 }
 0xa29   : > { %v2489_v3 = vpack.i.bf16 %v1355_v2, %v1353_v1 }
 0xa2b   : > { %2490 = vrot.lane.b32.xlu0 %v2489_v3, %s3135_s27 }
 0xa30   : > { %v1359_v4 = vpop.permute.xlu0 %1358 }
 0xa31   : > { %1370 = vxpose.xlu2.b32.start.end [1/1] (short) (narrow) %v1359_v4, 8 }
 0xa8b   : > { %v1365_v5 = vpop.permute.xlu1 %1364 }
 0xa8c   : > { %1466 = vxpose.xlu0.b32.start.end [1/1] (short) (narrow) %v1365_v5, 8 }
 0xa9d   : > { %v2491_v6 = vpop.permute.xlu0 %2490 }
 0xa9e   : > { %2495 = vxpose.xlu1.b32.start.end [1/1] (short) (narrow) %v2491_v6, 8 }
 0xaca   : > { %v1386_v7 = vpop.trf.xlu2 }
 0xacb   : > { %1515 = vmatpush.msrb.mxu2 %v1386_v7 }
 0xacc   : > { %2392 = vmatmul.msk.f32.vlgmr.msrb.gmra.mxu2 %vm567_vm5, %v1348_v62 }
 0xb30   : > { %v1482_v8 = vpop.trf.xlu0 }
 0xb31   : > { %1581 = vmatpush.msra.mxu2 %v1482_v8 }
 0xb32   : > { %2395 = vmatmul.msk.f32.vlgmr.msra.gmra.mxu2 %vm567_vm5, %v1357_v63 }
 0xb42   : > { %v2496_v9 = vpop.trf.xlu1 }
 0xb43   : > { %v2500_v10 = vunpack.i.h.bf16 %v2496_v9  ;;  %v2497_v11 = vunpack.i.l.bf16 %v2496_v9 }
 0xb45   : > { %1537 = vmatpush.msra.mxu3 %v2497_v11  ;;  %1559 = vmatpush.msrb.mxu1 %v2500_v10 }
 0xb46   : > { %2393 = vmatmul.msk.f32.vlgmr.msra.gmra.mxu3 %vm567_vm5, %v1353_v1  ;;  %2394 = vmatmul.msk.f32.vlgmr.msrb.gmra.mxu1 %vm567_vm5, %v1355_v2 }
 0xb4f   : > { %v1517_v12 = vpop.f32.mrf.mxu2 }
 0xb50   : > { %v1518_v14 = vadd.f32 %v1517_v12, %v2771_v40 }
 0xb52   : > { %v1586_v15 = vsel %vm567_vm5, %v1518_v14, -inf }
 0xb53   : > { %1587 = vmax.xlane.f32.xlu0 %v1586_v15 }
 0xb67   : > { %1636 = vrot.lane.b32.xlu0 %v1357_v63, %s3136_s26 }
 0xbb5   : > { %v1583_v0 = vpop.f32.mrf.mxu2 }
 0xbb6   : > { %v1584_v16 = vadd.f32 %v1583_v0, %v2792_v55 }
 0xbb8   : > { %v1595_v17 = vsel %vm567_vm5, %v1584_v16, -inf }
 0xbb9   : > { %1596 = vmax.xlane.f32.xlu2 %v1595_v17 }
 0xbc3   : > { %v1561_v20 = vpop.f32.mrf.mxu1 }
 0xbc4   : > { %v1562_v21 = vadd.f32 %v1561_v20, %v2783_v47 }
 0xbc6   : > { %v1588_v18 = vpop.xlane.xlu0 %1587  ;;  %v1592_v23 = vsel %vm567_vm5, %v1562_v21, -inf }
 0xbc7   : > { %v1598_v19 = vsub.f32 %v1518_v14, %v1588_v18  ;;  %1593 = vmax.xlane.f32.xlu1 %v1592_v23 }
 0xbc9   : > { %v1602_v22 = vmul.f32 1.442695, %v1598_v19  ;;  %v1539_v40 = vpop.f32.mrf.mxu3 }
 0xbca   : > { %v1540_v24 = vadd.f32 %v1539_v40, %v2781_v46 }
 0xbcb   : > { %2526 = vpow2.f32 %v1602_v22 }
 0xbcc   : > { %v1589_v25 = vsel %vm567_vm5, %v1540_v24, -inf }
 0xbcd   : > { %1590 = vmax.xlane.f32.xlu0 %v1589_v25 }
 0xbd1   : > { %v2527_v26 = vpop.eup %2526  ;;  %1630 = vrot.lane.b32.xlu2 %v1348_v62, %s3136_s26 }
 0xbd2   : > { %v1610_v55 = vsel %vm567_vm5, %v2527_v26, 0.0 }
 0xbd3   : > { %1611 = vadd.xlane.f32.xlu1 %v1610_v55 }
 0xbd9   : > { %1632 = vrot.lane.b32.xlu2 %v1353_v1, %s3136_s26  ;;  %v1637_v47 = vpop.permute.xlu0 %1636 }
 0xbe1   : > { %1634 = vrot.lane.b32.xlu0 %v1355_v2, %s3136_s26 }
 0xbff   : > { %1738 = vxpose.xlu2.b32.start.end [1/1] (short) (narrow) %v1637_v47, 8 }
 0xc2c   : > { %v1597_v27 = vpop.xlane.xlu2 %1596 }
 0xc2d   : > { %v1601_v30 = vsub.f32 %v1584_v16, %v1597_v27 }
 0xc2f   : > { %v1608_v31 = vmul.f32 1.442695, %v1601_v30 }
 0xc34   : > { %v1631_v49 = vpop.permute.xlu2 %1630 }
 0xc3a   : > { %v1594_v28 = vpop.xlane.xlu1 %1593 }
 0xc3b   : > { %v1600_v29 = vsub.f32 %v1562_v21, %v1594_v28 }
 0xc3c   : > { %v1633_v50 = vpop.permute.xlu2 %1632 }
 0xc3d   : > { %v1606_v46 = vmul.f32 1.442695, %v1600_v29 }
 0xc3f   : > { %2528 = vpow2.f32 %v1606_v46 }
 0xc40   : > { %v1591_v32 = vpop.xlane.xlu0 %1590 }
 0xc41   : > { %v1599_v33 = vsub.f32 %v1540_v24, %v1591_v32 }
 0xc43   : > { %v1604_v35 = vmul.f32 1.442695, %v1599_v33 }
 0xc45   : > { %v2529_v36 = vpop.eup %2528 }
 0xc46   : > { %v1612_v34 = vpop.xlane.xlu1 %1611  ;;  %v1616_v37 = vsel %vm567_vm5, %v2529_v36, 0.0 }
 0xc47   : > { %2530 = vrcp.f32 %v1612_v34  ;;  %1617 = vadd.xlane.f32.xlu1 %v1616_v37 }
 0xc48   : > { %2532 = vpow2.f32 %v1608_v31 }
 0xc49   : > { %2534 = vpow2.f32 %v1604_v35 }
 0xc4d   : > { %v2531_v39 = vpop.eup %2530 }
 0xc4e   : > { %v2533_v41 = vpop.eup %2532  ;;  %v1626_v42 = vmul.f32 %v2531_v39, %v2527_v26 }
 0xc4f   : > { %v2535_v43 = vpop.eup %2534  ;;  %v1619_v45 = vsel %vm567_vm5, %v2533_v41, 0.0 }
 0xc50   : > { %2396 = vmatpush.xpose.msk.msrb.mxu3 %vm567_vm5, %v1626_v42  ;;  %v1613_v44 = vsel %vm567_vm5, %v2535_v43, 0.0  ;;  %1620 = vadd.xlane.f32.xlu1 %v1619_v45 }
 0xc51   : > { %1614 = vadd.xlane.f32.xlu0 %v1613_v44 }
 0xc53   : > { %v1635_v48 = vpop.permute.xlu0 %1634 }
 0xc54   : > { %1706 = vxpose.xlu2.b32.start.end [1/1] (short) (narrow) %v1635_v48, 8 }
 0xc7a   : > { %1674 = vxpose.xlu0.b32.start.end [1/1] (short) (narrow) %v1633_v50, 8 }
 0xc8a   : > { %1642 = vxpose.xlu1.b32.start.end [1/1] (short) (narrow) %v1631_v49, 8 }
 0xc98   : > { %v1754_v63 = vpop.trf.xlu2 }
 0xcba   : > { %v1618_v52 = vpop.xlane.xlu1 %1617 }
 0xcbb   : > { %2536 = vrcp.f32 %v1618_v52 }
 0xcc1   : > { %v2537_v54 = vpop.eup %2536 }
 0xcc2   : > { %v1628_v56 = vmul.f32 %v2537_v54, %v2529_v36 }
 0xcc3   : > { %v1621_v57 = vpop.xlane.xlu1 %1620 }
 0xcc4   : > { %v1615_v53 = vpop.xlane.xlu0 %1614  ;;  %2400 = vmatpush.xpose.msk.msra.mxu1 %vm567_vm5, %v1628_v56 }
 0xcc5   : > { %2538 = vrcp.f32 %v1615_v53 }
 0xcc6   : > { %2540 = vrcp.f32 %v1621_v57 }
 0xccb   : > { %v2539_v58 = vpop.eup %2538 }
 0xccc   : > { %v1627_v59 = vmul.f32 %v2539_v58, %v2535_v43  ;;  %v2541_v60 = vpop.eup %2540 }
 0xccd   : > { %v1629_v62 = vmul.f32 %v2541_v60, %v2533_v41 }
 0xcce   : > { %2398 = vmatpush.xpose.msk.msrb.mxu0 %vm567_vm5, %v1627_v59 }
 0xccf   : > { %2402 = vmatpush.xpose.msk.msrb.mxu2 %vm567_vm5, %v1629_v62 }
 0xcd2   : > { %2403 = vmatmul.msk.f32.vlgmr.msrb.gmra.mxu2 %vm567_vm5, %v1754_v63 }
 0xced   : > { %v1722_v1 = vpop.trf.xlu2 }
 0xcee   : > { %2401 = vmatmul.msk.f32.vlgmr.msra.gmra.mxu1 %vm567_vm5, %v1722_v1 }
 0xd1e   : > { %v1690_v2 = vpop.trf.xlu0 }
 0xd1f   : > { %2399 = vmatmul.msk.f32.vlgmr.msrb.gmra.mxu0 %vm567_vm5, %v1690_v2 }
 0xd2e   : > { %v1658_v3 = vpop.trf.xlu1 }
 0xd2f   : > { %2397 = vmatmul.msk.f32.vlgmr.msrb.gmra.mxu3 %vm567_vm5, %v1658_v3 }
 0xd55   : > { %v1871_v4 = vpop.f32.mrf.mxu2 }
 0xd56   : > { %1970 = vxpose.xlu1.b32.start.end [1/1] (short) (narrow) %v1871_v4, 8 }
 0xd6b   : > { %v1845_v6 = vpop.f32.mrf.mxu1 }
 0xd9c   : > { %v1819_v7 = vpop.f32.mrf.mxu0 }
 0xdb2   : > { %v1793_v5 = vpop.f32.mrf.mxu3 }
 0xdb3   : > { %1874 = vxpose.xlu2.b32.start.end [1/1] (short) (narrow) %v1793_v5, 8 }
 0xdbb   : > { %1938 = vxpose.xlu2.b32.start.end [1/1] (short) (narrow) %v1845_v6, 8 }
 0xdc3   : > { %1906 = vxpose.xlu2.b32.start.end [1/1] (short) (narrow) %v1819_v7, 8 }
 0xdfa   : > { %v1986_v11 = vpop.trf.xlu1 }
 0xdfb   : > { %v2014_v0 = vrot.slane %v1986_v11, 4 }
 0xe4c   : > { %v1890_v8 = vpop.trf.xlu2 }
 0xe4d   : > { %v2004_v12 = vrot.slane %v1890_v8, 4 }
 0xe54   : > { %v1954_v9 = vpop.trf.xlu2 }
 0xe55   : > { %v2002_v10 = vrot.slane %v1954_v9, 4  ;;  %v2005_v15 = vsel %vm1073_vm6, %v1954_v9, %v2004_v12 }
 0xe56   : > { %v2013_v17 = vperm.slane %v2005_v15, %v2812_v51  ;;  %v2405_v15 = vld [vmem:[%s3117_s5 + $0x28] sm:$0xff] }
 0xe57   : > { %v2003_v14 = vsel %vm1073_vm6, %v2002_v10, %v1890_v8 }
 0xe58   : > { %v2009_v16 = vperm.slane %v2003_v14, %v2812_v51  ;;  %v2040_v40 = vrot.slane %v2013_v17, 4  ;;  %v2407_v14 = vld [vmem:[%s3117_s5 + $0x38] sm:$0xff] }
 0xe59   : > { %2147 = vmatpush.msra.mxu3 %v2407_v14 }
 0xe5a   : > { %v2028_v21 = vrot.slane %v2009_v16, 4 }
 0xe5c   : > { %v1922_v18 = vpop.trf.xlu2 }
 0xe5d   : > { %v2015_v19 = vsel %vm1073_vm6, %v2014_v0, %v1922_v18  ;;  %v2016_v20 = vrot.slane %v1922_v18, 4  ;;  %v2404_v0 = vld [vmem:[%s3117_s5 + $0x20] sm:$0xff] }
 0xe5e   : > { %v2021_v22 = vperm.slane %v2015_v19, %v2812_v51 }
 0xe5f   : > { %v2017_v23 = vsel %vm1073_vm6, %v1986_v11, %v2016_v20 }
 0xe60   : > { %v2025_v24 = vperm.slane %v2017_v23, %v2812_v51  ;;  %v2026_v25 = vrot.slane %v2021_v22, 4  ;;  %v2029_v26 = vsel %vm1073_vm6, %v2021_v22, %v2028_v21 }
 0xe61   : > { %v2037_v55 = vperm.slane %v2029_v26, %v2818_v61  ;;  %v2411_v26 = vld [vmem:[%s3118_s6 + $0x30] sm:$0xff] }
 0xe62   : > { %v2027_v47 = vsel %vm1073_vm6, %v2026_v25, %v2009_v16  ;;  %v2038_v27 = vrot.slane %v2025_v24, 4  ;;  %v2041_v28 = vsel %vm1073_vm6, %v2025_v24, %v2040_v40  ;;  %v2412_v25 = vld [vmem:[%s3118_s6 + $0x38] sm:$0xff] }
 0xe63   : > { %v2033_v29 = vperm.slane %v2027_v47, %v2818_v61  ;;  %v2049_v30 = vperm.slane %v2041_v28, %v2818_v61  ;;  %v2052_v46 = vrot.slane %v2037_v55, 4  ;;  %2193 = vmatpush.msra.mxu0 %v2412_v25  ;;  %v2410_v55 = vld [vmem:[%s3118_s6 + $0x28] sm:$0xff]  ;;  %v2421_v47 = vld [vmem:[%s3119_s7 + $0x78] sm:$0xff] }
 0xe64   : > { %v2039_v31 = vsel %vm1073_vm6, %v2038_v27, %v2013_v17  ;;  %v2420_v27 = vld [vmem:[%s3119_s7 + $0x70] sm:$0xff]  ;;  %2222 = vmatpush.msrb.mxu1 %v2421_v47  ;;  %v2419_v28 = vld [vmem:[%s3119_s7 + $0x68] sm:$0xff] }
 0xe65   : > { %v2045_v32 = vperm.slane %v2039_v31, %v2818_v61  ;;  %v2050_v33 = vrot.slane %v2033_v29, 4  ;;  %v2053_v34 = vsel %vm1073_vm6, 0.0, %v2052_v46  ;;  %v2056_v35 = vrot.slane %v2049_v30, 4  ;;  %2194 = vmatpush.msra.mxu0 %v2411_v26  ;;  %v2417_v30 = vld [vmem:[%s3119_s7 + $0x58] sm:$0xff] }
 0xe66   : > { %v2058_v36 = vsel %vm1073_vm6, %v2052_v46, %v2033_v29  ;;  %v2063_v37 = vrot.slane %v2053_v34, 4  ;;  %2223 = vmatpush.msrb.mxu1 %v2420_v27  ;;  %v2418_v29 = vld [vmem:[%s3119_s7 + $0x60] sm:$0xff] }
 0xe67   : > { %v2051_v39 = vsel %vm1073_vm6, 0.0, %v2050_v33  ;;  %v2054_v41 = vrot.slane %v2045_v32, 4  ;;  %v2057_v42 = vsel %vm1073_vm6, 0.0, %v2056_v35  ;;  %v2062_v43 = vperm.slane %v2058_v36, %v2812_v51  ;;  %2195 = vmatpush.msra.mxu0 %v2410_v55 }
 0xe68   : > { %v2074_v44 = vrot.slane %v2057_v42, 4  ;;  %v2064_v45 = vsel %vm1073_vm6, %v2063_v37, %v2051_v39  ;;  %v2069_v48 = vsel %vm1073_vm6, %v2056_v35, %v2045_v32  ;;  %2224 = vmatpush.msrb.mxu1 %v2419_v28  ;;  %v2416_v32 = vld [vmem:[%s3119_s7 + $0x50] sm:$0xff] }
 0xe69   : > { %v2055_v49 = vsel %vm1073_vm6, 0.0, %v2054_v41  ;;  %v2068_v50 = vperm.slane %v2064_v45, %v2812_v51  ;;  %v2073_v52 = vperm.slane %v2069_v48, %v2812_v51  ;;  %v2082_v53 = vrot.slane %v2062_v43, 4  ;;  %v2414_v45 = vld [vmem:[%s3119_s7 + $0x40] sm:$0xff] }
 0xe6a   : > { %v2075_v54 = vsel %vm1073_vm6, %v2074_v44, %v2055_v49  ;;  %2225 = vmatpush.msrb.mxu1 %v2418_v29  ;;  %v2415_v44 = vld [vmem:[%s3119_s7 + $0x48] sm:$0xff] }
 0xe6b   : > { %v2079_v56 = vperm.slane %v2075_v54, %v2812_v51  ;;  %v2083_v57 = vsel %vm1073_vm6, %v2068_v50, %v2082_v53  ;;  %v2094_v58 = vrot.slane %v2073_v52, 4  ;;  %v2080_v59 = vrot.slane %v2068_v50, 4 }
 0xe6c   : > { %v2091_v60 = vperm.slane %v2083_v57, %v2818_v61  ;;  %2226 = vmatpush.msrb.mxu1 %v2417_v30 }
 0xe6d   : > { %v2095_v62 = vsel %vm1073_vm6, %v2079_v56, %v2094_v58  ;;  %v2081_v63 = vsel %vm1073_vm6, %v2080_v59, %v2062_v43  ;;  %v2092_v1 = vrot.slane %v2079_v56, 4 }
 0xe6e   : > { %v2103_v2 = vperm.slane %v2095_v62, %v2818_v61  ;;  %v2110_v3 = vrot.slane %v2091_v60, 4  ;;  %v2087_v4 = vperm.slane %v2081_v63, %v2818_v61  ;;  %2227 = vmatpush.msrb.mxu1 %v2416_v32 }
 0xe6f   : > { %v2093_v5 = vsel %vm1073_vm6, %v2092_v1, %v2073_v52 }
 0xe70   : > { %v2111_v51 = vsel %vm1073_vm6, %v2103_v2, %v2110_v3  ;;  %v2108_v6 = vrot.slane %v2103_v2, 4  ;;  %v2099_v7 = vperm.slane %v2093_v5, %v2818_v61  ;;  %v2106_v8 = vrot.slane %v2087_v4, 4  ;;  %v2406_v61 = vld [vmem:[%s3117_s5 + $0x30] sm:$0xff]  ;;  %2228 = vmatpush.msrb.mxu1 %v2415_v44  ;;  %v2276_v5 = vld [vmem:[%s3120_s8] sm:$0x1] }
 0xe71   : > { %2121 = vrot.lane.b32.xlu0 %v2111_v51, %s3137_s28  ;;  %2148 = vmatpush.msra.mxu3 %v2406_v61  ;;  %s344_s28 = scalar_lea.vmem [#allocation2], %s343_s24 }
 0xe72   : > { %v2109_v9 = vsel %vm1073_vm6, %v2108_v6, %v2091_v60  ;;  %v2104_v10 = vrot.slane %v2099_v7, 4  ;;  %v2107_v11 = vsel %vm1073_vm6, %v2099_v7, %v2106_v8  ;;  %2229 = vmatpush.msrb.mxu1 %v2414_v45 }
 0xe73   : > { %2117 = vrot.lane.b32.xlu2 %v2109_v9, %s3138_s29  ;;  %2113 = vrot.lane.b32.xlu1 %v2107_v11, %s3139_s16  ;;  %s2291_s29 = sshll.u32 %s344_s28, 4  ;;  %s2281_s16 = scalar_lea.sflag [#allocation3], %s343_s24  ;;  %s2292_s29 = int_to_ptr.vmem [resolvable:$true] %s2291_s29 }
 0xe74   : > { %v2105_v12 = vsel %vm1073_vm6, %v2104_v10, %v2087_v4  ;;  %2149 = vmatpush.msra.mxu3 %v2405_v15 }
 0xe76   : > { %2150 = vmatpush.msra.mxu3 %v2404_v0 }
 0xecd   : > { %v2118_v17 = vpop.permute.xlu2 %2117 }
 0xee3   : > { %v2122_v19 = vpop.permute.xlu0 %2121 }
 0xee5   : > { %v2114_v16 = vpop.permute.xlu1 %2113 }
 0xee6   : > { %v2124_v18 = vsel %vm567_vm5, %v2105_v12, %v2114_v16 }
 0xee7   : > { %v2125_v20 = vsel %vm1196_vm7, %v2124_v18, %v2118_v17  ;;  %vm2278_vm7 = vcmask 253952  }
 0xee8   : > { %v2126_v21 = vsel %vm1198_vm8, %v2125_v20, %v2122_v19 }
 0xee9   : > { %2408 = vmatmul.msk.f32.vlgmr.msra.gmra.mxu3 %vm369_vm0, %v2126_v21 }
 0xf6c   : > { %v2152_v22 = vpop.f32.mrf.mxu3 }
 0xf6d   : > { %v2155_v23 = vadd.f32 %v2152_v22, %v2916_v38  ;;  %v2409_v38 = vld [vmem:[%s3118_s6 + $0x20] sm:$0xff] }
 0xf6e   : > { %2196 = vmatpush.msra.mxu0 %v2409_v38 }
 0xf6f   : > { %v2156_v40 = vmul.f32 %v2155_v23, %v2155_v23 }
 0xf71   : > { %v2157_v24 = vsel %vm369_vm0, %v2156_v40, 0.0 }
 0xf72   : > { %2158 = vadd.xlane.f32.xlu1 %v2157_v24 }
 0xfe5   : > { %v2159_v46 = vpop.xlane.xlu1 %2158 }
 0xfe6   : > { %v2160_v31 = vmul.f32 %v2159_v46, %v2744_v13 }
 0xfe8   : > { %v2161_v33 = vadd.f32 1e-06, %v2160_v31 }
 0xfea   : > { %2542 = vrsqrt.f32 %v2161_v33  ;;  %vm2168_vm2 = vweird.f32 %v2161_v33 }
 0xff0   : > { %v2543_v34 = vpop.eup %2542 }
 0xff1   : > { %v2163_v35 = vmul.f32 %v2543_v34, %v2161_v33  ;;  %vm2169_vm1 = vweird.f32 %v2543_v34 }
 0xff2   : > { %vm2170_vm3 = vmor %vm2168_vm2, %vm2169_vm1 }
 0xff3   : > { %v2164_v36 = vmul.f32 %v2543_v34, %v2163_v35 }
 0xff5   : > { %v2165_v37 = vmul.f32 0.5, %v2164_v36 }
 0xff7   : > { %v2166_v39 = vsub.f32 1.5, %v2165_v37 }
 0xff9   : > { %v2167_v41 = vmul.f32 %v2543_v34, %v2166_v39 }
 0xffb   : > { %v2171_v42 = vsel %vm2170_vm3, %v2543_v34, %v2167_v41 }
 0xffc   : > { %v2172_v43 = vmul.f32 %v2171_v42, %v2155_v23 }
 0xffe   : > { %2413 = vmatmul.msk.f32.vlgmr.msra.gmra.mxu0 %vm369_vm0, %v2172_v43 }
0x107b   : > { %v2198_v48 = vpop.f32.mrf.mxu0 }
0x107c   : > { %v2201_v49 = vmax.f32 %v2198_v48, 0.0 }
0x107e   : > { %2422 = vmatmul.msk.f32.vlgmr.msrb.gmra.mxu1 %vm1281_vm12, %v2201_v49 }
0x10fb   : > { %v2231_v50 = vpop.f32.mrf.mxu1 }
0x10fc   : > { %v2234_v52 = vadd.f32 %v2231_v50, %v2155_v23 }
0x10fe   : > { %v2235_v53 = vmul.f32 %v2234_v52, %v2234_v52 }
0x1100   : > { %v2236_v54 = vsel %vm369_vm0, %v2235_v53, 0.0 }
0x1101   : > { %2237 = vadd.xlane.f32.xlu2 %v2236_v54 }
0x1174   : > { %v2238_v56 = vpop.xlane.xlu2 %2237 }
0x1175   : > { %v2239_v57 = vmul.f32 %v2238_v56, %v2744_v13  ;;  %v2252_v13 = vld [vmem:[%s354_s22] sm:$0x1]  ;;  %s2562_s22 = scalar_lea.hbm %s2561_s25, 1 }
0x1176   : > { %p2563_p11 = scmp.ne.s32.totalorder %s2561_s25, %s2562_s22  ;;  %p2568_p1 = scmp.lt.s32.totalorder %s2566_s23, %s2562_s22 }
0x1177   : > { %v2240_v58 = vadd.f32 1e-06, %v2239_v57 }
0x1178   : > { %p2564_p12 = pnand %p2563_p11, %p2709_p5  ;;  %p2569_p2 = por %p2568_p1, %p2567_p0 }
0x1179   : > { %2544 = vrsqrt.f32 %v2240_v58  ;;  %vm2247_vm6 = vweird.f32 %v2240_v58 }
0x117a   : > { %p2565_p13 = pneg %p2564_p12 }
0x117c   : > { %p2570_p3 = pnand %p2569_p2, %p2565_p13 }
0x117f   : > { %v2545_v59 = vpop.eup %2544 }
0x1180   : > { %v2242_v60 = vmul.f32 %v2545_v59, %v2240_v58  ;;  %vm2248_vm4 = vweird.f32 %v2545_v59 }
0x1181   : > { %vm2249_vm0 = vmor %vm2247_vm6, %vm2248_vm4 }
0x1182   : > { %v2243_v62 = vmul.f32 %v2545_v59, %v2242_v60 }
0x1184   : > { %v2244_v63 = vmul.f32 0.5, %v2243_v62 }
0x1186   : > { %v2245_v1 = vsub.f32 1.5, %v2244_v63 }
0x1188   : > { %v2246_v2 = vmul.f32 %v2545_v59, %v2245_v1 }
0x118a   : > { %v2250_v3 = vsel %vm2249_vm0, %v2545_v59, %v2246_v2 }
0x118b   : > { %v2251_v4 = vmul.f32 %v2250_v3, %v2234_v52 }
0x118d   : > { %2271 = vmatpush.msra.mxu2 %v2251_v4 }
0x118e   : > { %2423 = vmatmul.msk.f32.vlgmr.msra.gmra.mxu2 %vm567_vm5, %v2252_v13 }
0x1211   : > { %v2273_v51 = vpop.f32.mrf.mxu2 }
0x1212   : > { %v2277_v6 = vmul.f32 %v2276_v5, %v2273_v51 }
0x1214   : > { %2279 = vst.msk [vmem:[%s344_s28] sm:$0x1] %vm2278_vm7, %v2277_v6 }
0x1215   : > { %2573 = shalt.err (!%p2570_p3)
}
0x1216   : > { %2426 = dma.vmem_to_hbm [thread:$0]  (%p2709_p5), %s2292_s29, 16, %s2294_s21, %s2281_s16  }
0x1217 PF: > { %p2432_p4 = scmp.ge.s32.totalorder %s2608_s12, 2  ;;  %s2305_s24 = sand.u32 1, %s2596_s30  }
0x1218   : > { %s2306_s26 = scalar_lea.sflag [#allocation3], %s2305_s24 }
0x1219   : > { %p2429_p7 = pnand %p2432_p4, %p2713_p6 }
0x121b   : > { %p2430_p8 = pneg %p2429_p7 }
0x121d   : > { %2591 = dma.done.wait (%p2430_p8), %s2306_s26, 16  }
0x121e   : > { %2593 = vsyncadd (%p2430_p8), %s2306_s26, 4294967280  ;;  %p19_p9 = scmp.ge.s32.totalorder %s2696_s15, 4   ;;  %s3140_s30 = smov %s2600_s10 }
0x121f   : > { %s3141_s10 = smov %s2604_s11  ;;  %s3142_s11 = smov %s2707_s18 }
0x1220   : > { %s3143_s12 = smov %s2696_s15  ;;  %21 = sbr.rel (!%p19_p9) target bundleno = 3 (0x3), region = 101 }
0x1225   :  { %2311 = vsyncpa [#allocation3], 1 }
0x1226   :  { %2313 = vsyncpa [#allocation3 + $0x1], 1 }

</bundles_post_ra>
